<compile_context>
chip_gen: v7x
topology: tpu7x:2x2x1
jax: 0.10.0
libtpu: 0.0.40
codegen_flags: <defaults>
</compile_context>

<pallas_src>
import functools

import jax
import jax.numpy as jnp
from jax.experimental import pallas as pl
from jax.experimental.pallas import tpu as pltpu

KH = KW = 4
STRIDE = 2
PAD = 15


def _elu(v):
    # ELU(alpha=1): x if x > 0 else exp(x) - 1  (clamp exp arg to avoid overflow)
    return jnp.where(v > 0, v, jnp.exp(jnp.minimum(v, 0.0)) - 1.0)


def _fused_conv_kernel(a1_ref, w1_ref, b1_ref, w2_ref, b2_ref, out_ref, ps_ref,
                       *, WS, N2):
    # a1_ref : (1, SR, 4*K1)  conv1 im2col; row s = i*WS + j holds the 4 phase
    #                         patches (hb, wb) concatenated along K
    # w1_ref : (4*K1, 4*C1)   block-diag(W1, W1, W1, W1)
    # b1_ref : (1, 4*C1)      b1 tiled over the 4 phases
    # w2_ref : (4, 4*C1, C2)  conv2 weights grouped by (ha, wa) = (kh//2, kw//2),
    #                         K ordered [(hb, wb) x C1]  -> 4 K=256 matmuls
    # b2_ref : (1, C2)
    # out_ref: (1, M2, C2)    interior conv2 output, flat row = m*WS + n
    # ps_ref : (SR, 4*C1)     lane-packed conv2 input (phase-split conv1 act.)
    M2 = N2 * WS

    # conv1 (+bias+ELU): one matmul whose output IS the packed scratch.
    h = jnp.dot(a1_ref[0], w1_ref[...], preferred_element_type=jnp.float32)
    ps_ref[...] = _elu(h + b1_ref[...])

    # conv2: 4 K=256 matmuls summed as values; single fused bias+ELU store.
    acc = None
    for g in range(4):
        ha, wa = g // 2, g % 2
        s0 = ha * WS + wa
        part = jnp.dot(ps_ref[s0:s0 + M2, :], w2_ref[g],
                       preferred_element_type=jnp.float32)
        acc = part if acc is None else acc + part
    out_ref[0, :, :] = _elu(acc + b2_ref[...])


def conv_layers_forward(x, params):
    """Forward pass of ConvLayers: ELU(conv2(ELU(conv1(x)))), NCHW in/out."""
    w1, b1, w2, b2 = params
    N, C, H, W = x.shape
    assert H == W and STRIDE == 2
    C1 = w1.shape[0]
    C2 = w2.shape[0]
    K1 = C * KH * KW
    f32 = jnp.float32

    OH1 = (H + 2 * PAD - KH) // STRIDE + 1
    OH2 = (OH1 + 2 * PAD - KH) // STRIDE + 1

    # conv1 outputs depending on the image: rows/cols in [D1LO, D1HI]
    D1LO = max(0, -(-(PAD - KH + 1) // STRIDE))
    D1HI = min(OH1 - 1, (H - 1 + PAD) // STRIDE)
    # conv2 outputs depending on the image: rows/cols in [O2LO, O2HI]
    O2LO = max(0, -(-(D1LO + PAD - KH + 1) // STRIDE))
    O2HI = min(OH2 - 1, (D1HI + PAD) // STRIDE)
    assert D1LO <= D1HI and O2LO <= O2HI
    N2 = O2HI - O2LO + 1                       # interior size (7 for 16x16)
    R0 = STRIDE * O2LO - PAD                   # first conv1 row/col the interior needs
    # interior conv2 windows must never touch conv2's zero padding
    assert R0 >= 0 and STRIDE * O2HI - PAD + KH - 1 <= OH1 - 1

    WS = ((N2 + 1 + 7) // 8) * 8               # flat col stride (>= N2+1, mult of 8)
    JC = N2 + 1                                # scratch cols that are actually read
    SRI = N2 + 2                               # scratch row groups (covers tap shifts)
    SR = SRI * WS                              # scratch rows
    M2 = N2 * WS                               # kernel output rows (cols >= N2 junk)

    # ---- conv1 im2col -> (N, SR, 4*K1): rows pre-arranged as the packed scratch ----
    xt = jnp.transpose(x, (0, 2, 3, 1)).astype(f32)                    # NHWC
    xp = jnp.pad(xt, ((0, 0), (PAD, PAD), (PAD, PAD), (0, 0)))
    Hp = H + 2 * PAD
    assert 2 * R0 + (KH - 1) + 2 * (2 * SRI - 1) <= Hp - 1
    assert 2 * R0 + (KW - 1) + 2 * (2 * JC - 1) <= Hp - 1
    taps = []
    for kh in range(KH):
        for kw in range(KW):
            rb, cb = 2 * R0 + kh, 2 * R0 + kw
            taps.append(xp[:, rb: rb + 2 * (2 * SRI - 1) + 1: 2,
                           cb: cb + 2 * (2 * JC - 1) + 1: 2, :])       # (N,2*SRI,2*JC,C)
    pat = jnp.stack(taps, axis=-1).reshape(N, 2 * SRI, 2 * JC, K1)     # K = (c, kh, kw)
    blocks = [jnp.pad(pat[:, hb::2, wb::2, :],
                      ((0, 0), (0, 0), (0, WS - JC), (0, 0)))
              for hb in range(2) for wb in range(2)]                   # ph = hb*2 + wb
    a1 = jnp.concatenate(blocks, axis=-1).reshape(N, SR, 4 * K1)

    # ---- weights / biases in kernel layout ----
    w1m = w1.reshape(C1, K1).T.astype(f32)                             # (K1, C1)
    w1blk = jnp.kron(jnp.eye(4, dtype=f32), w1m)                       # (4*K1, 4*C1)
    b1t = jnp.tile(b1.astype(f32), 4).reshape(1, 4 * C1)
    w2r = w2.astype(f32).reshape(C2, C1, 2, 2, 2, 2)                   # (c2,c1,ha,hb,wa,wb)
    w2g = jnp.transpose(w2r, (2, 4, 3, 5, 1, 0)).reshape(4, 4 * C1, C2)
    b2m = b2.reshape(1, C2).astype(f32)

    kernel = functools.partial(_fused_conv_kernel, WS=WS, N2=N2)
    out_k = pl.pallas_call(
        kernel,
        out_shape=jax.ShapeDtypeStruct((N, M2, C2), f32),
        grid_spec=pltpu.PrefetchScalarGridSpec(
            num_scalar_prefetch=0,
            grid=(N,),
            in_specs=[
                pl.BlockSpec((1, SR, 4 * K1), lambda n: (n, 0, 0)),
                pl.BlockSpec((4 * K1, 4 * C1), lambda n: (0, 0)),
                pl.BlockSpec((1, 4 * C1), lambda n: (0, 0)),
                pl.BlockSpec((4, 4 * C1, C2), lambda n: (0, 0, 0)),
                pl.BlockSpec((1, C2), lambda n: (0, 0)),
            ],
            out_specs=pl.BlockSpec((1, M2, C2), lambda n: (n, 0, 0)),
            scratch_shapes=[pltpu.VMEM((SR, 4 * C1), f32)],
        ),
        compiler_params=pltpu.CompilerParams(
            dimension_semantics=("parallel",),
            vmem_limit_bytes=32 * 1024 * 1024,
        ),
    )(a1, w1blk, b1t, w2g, b2m)

    # ---- image-independent border pattern (function of b1, W2, b2 only) ----
    hp = jax.lax.Precision.HIGHEST             # tiny contractions; keep exact-ish
    a1c = _elu(b1.astype(f32))                                         # (C1,)
    tap_const = jnp.einsum('ocij,c->ijo', w2.astype(f32), a1c,
                           precision=hp)                               # (KH,KW,C2)
    pos = STRIDE * jnp.arange(OH2)[:, None] - PAD + jnp.arange(KH)[None, :]
    inb = ((pos >= 0) & (pos < OH1)).astype(f32)                       # (OH2, KH)
    border = _elu(jnp.einsum('ih,jw,hwo->ijo', inb, inb, tap_const,
                             precision=hp)
                  + b2.astype(f32)[None, None, :])                     # (OH2,OH2,C2)
    border = jnp.transpose(border, (2, 0, 1))                          # (C2,OH2,OH2)

    # ---- paste the kernel interior into the constant border (one transpose) ----
    interior = out_k.reshape(N, N2, WS, C2)[:, :, :N2, :]
    interior = jnp.transpose(interior, (0, 3, 1, 2))                   # (N,C2,N2,N2)
    full = jnp.broadcast_to(border[None], (N, C2, OH2, OH2))
    return full.at[:, :, O2LO:O2LO + N2, O2LO:O2LO + N2].set(interior)


def _reference_forward(x, params):
    """Pure-JAX reference (lax conv) for correctness check."""
    w1, b1, w2, b2 = params

    def conv_elu(x, w, b):
        y = jax.lax.conv_general_dilated(
            x, w, window_strides=(2, 2), padding=[(15, 15), (15, 15)],
            dimension_numbers=("NCHW", "OIHW", "NCHW"))
        y = y + b.reshape(1, -1, 1, 1)
        return jnp.where(y > 0, y, jnp.exp(jnp.minimum(y, 0.0)) - 1.0)

    return conv_elu(conv_elu(x, w1, b1), w2, b2)


if __name__ == "__main__":
    key = jax.random.PRNGKey(0)
    k_x, k_w1, k_b1, k_w2, k_b2 = jax.random.split(key, 5)

    # Small shapes consistent with the module: natural images, 3 channels, 16x16.
    batch, image_channels, image_size = 2, 3, 16
    x = jax.random.normal(k_x, (batch, image_channels, image_size, image_size),
                          dtype=jnp.float32)

    # Deterministic parameter init (shapes from ConvLayers.__init__).
    w1 = 0.1 * jax.random.normal(k_w1, (64, image_channels, 4, 4), dtype=jnp.float32)
    b1 = 0.1 * jax.random.normal(k_b1, (64,), dtype=jnp.float32)
    w2 = 0.05 * jax.random.normal(k_w2, (128, 64, 4, 4), dtype=jnp.float32)
    b2 = 0.1 * jax.random.normal(k_b2, (128,), dtype=jnp.float32)
    params = (w1, b1, w2, b2)

    fwd = jax.jit(conv_layers_forward)
    out = jax.block_until_ready(fwd(x, params))

    # out_channels = 128; spatial: 16 -> 22 -> 25 for these small inputs.
    assert out.shape == (batch, 128, 25, 25), out.shape

    ref = jax.block_until_ready(_reference_forward(x, params))
    err = float(jnp.max(jnp.abs(out - ref)))
    assert jnp.allclose(out, ref, atol=1e-4, rtol=1e-4), err

    print("KERNEL_OK")
</pallas_src>

<mosaic_0001>
module attributes {stable_mosaic.version = 11 : i64} {
  func.func @_fused_conv_kernel(%arg0: i32, %arg1: memref<1x72x192xf32, #tpu.memory_space<vmem>>, %arg2: memref<192x256xf32, #tpu.memory_space<vmem>>, %arg3: memref<1x256xf32, #tpu.memory_space<vmem>>, %arg4: memref<4x256x128xf32, #tpu.memory_space<vmem>>, %arg5: memref<1x128xf32, #tpu.memory_space<vmem>>, %arg6: memref<1x56x128xf32, #tpu.memory_space<vmem>>, %arg7: memref<72x256xf32, #tpu.memory_space<vmem>>) attributes {dimension_semantics = [#tpu.dimension_semantics<parallel>], iteration_bounds = array<i64: 2>, scalar_prefetch = 0 : i64, scratch_operands = 1 : i64, tpu.core_type = #tpu.core_type<tc>, window_params = [{transform_indices = @transform_0, window_bounds = array<i64: 1, 72, 192>}, {pipeline_mode = #tpu.pipeline_mode<synchronous>, transform_indices = @transform_1, window_bounds = array<i64: 192, 256>}, {pipeline_mode = #tpu.pipeline_mode<synchronous>, transform_indices = @transform_2, window_bounds = array<i64: 1, 256>}, {pipeline_mode = #tpu.pipeline_mode<synchronous>, transform_indices = @transform_3, window_bounds = array<i64: 4, 256, 128>}, {pipeline_mode = #tpu.pipeline_mode<synchronous>, transform_indices = @transform_4, window_bounds = array<i64: 1, 128>}, {transform_indices = @transform_5, window_bounds = array<i64: 1, 56, 128>}]} {
    %c0 = arith.constant 0 : index
    %c0_0 = arith.constant 0 : index
    %c0_1 = arith.constant 0 : index
    %0 = vector.load %arg1[%c0, %c0_0, %c0_1] : memref<1x72x192xf32, #tpu.memory_space<vmem>>, vector<1x72x192xf32>
    %1 = vector.shape_cast %0 : vector<1x72x192xf32> to vector<72x192xf32>
    %c0_2 = arith.constant 0 : index
    %c0_3 = arith.constant 0 : index
    %2 = vector.load %arg2[%c0_2, %c0_3] : memref<192x256xf32, #tpu.memory_space<vmem>>, vector<192x256xf32>
    %cst = arith.constant dense<0.000000e+00> : vector<72x256xf32>
    %3 = tpu.matmul %1, %2, %cst {dimension_numbers = #tpu.dot_dimension_numbers<[1], [0], [0], [1], [0, 0, 1, 1], [], []>} : vector<72x192xf32>, vector<192x256xf32>, vector<72x256xf32> -> vector<72x256xf32>
    %c0_4 = arith.constant 0 : index
    %c0_5 = arith.constant 0 : index
    %4 = vector.load %arg3[%c0_4, %c0_5] : memref<1x256xf32, #tpu.memory_space<vmem>>, vector<1x256xf32>
    %5 = vector.broadcast %4 : vector<1x256xf32> to vector<72x256xf32>
    %6 = arith.addf %3, %5 : vector<72x256xf32>
    %cst_6 = arith.constant 0.000000e+00 : f32
    %7 = vector.broadcast %cst_6 : f32 to vector<72x256xf32>
    %8 = arith.cmpf ogt, %6, %7 : vector<72x256xf32>
    %cst_7 = arith.constant 0.000000e+00 : f32
    %9 = vector.broadcast %cst_7 : f32 to vector<72x256xf32>
    %10 = arith.minimumf %6, %9 : vector<72x256xf32>
    %11 = math.exp %10 : vector<72x256xf32>
    %cst_8 = arith.constant 1.000000e+00 : f32
    %12 = vector.broadcast %cst_8 : f32 to vector<72x256xf32>
    %13 = arith.subf %11, %12 : vector<72x256xf32>
    %14 = arith.select %8, %6, %13 : vector<72x256xi1>, vector<72x256xf32>
    %c0_9 = arith.constant 0 : index
    %c0_10 = arith.constant 0 : index
    %15 = vector.load %arg7[%c0_9, %c0_10] : memref<72x256xf32, #tpu.memory_space<vmem>>, vector<72x256xf32>
    tpu.vector_store %arg7[%c0_9, %c0_10], %14 {strides = array<i32>} : memref<72x256xf32, #tpu.memory_space<vmem>>, vector<72x256xf32>,
    %c0_11 = arith.constant 0 : index
    %c0_12 = arith.constant 0 : index
    %16 = vector.load %arg7[%c0_11, %c0_12] : memref<72x256xf32, #tpu.memory_space<vmem>>, vector<56x256xf32>
    %c0_13 = arith.constant 0 : index
    %c0_14 = arith.constant 0 : index
    %c0_15 = arith.constant 0 : index
    %17 = vector.load %arg4[%c0_13, %c0_14, %c0_15] : memref<4x256x128xf32, #tpu.memory_space<vmem>>, vector<1x256x128xf32>
    %18 = vector.shape_cast %17 : vector<1x256x128xf32> to vector<256x128xf32>
    %cst_16 = arith.constant dense<0.000000e+00> : vector<56x128xf32>
    %19 = tpu.matmul %16, %18, %cst_16 {dimension_numbers = #tpu.dot_dimension_numbers<[1], [0], [0], [1], [0, 0, 1, 1], [], []>} : vector<56x256xf32>, vector<256x128xf32>, vector<56x128xf32> -> vector<56x128xf32>
    %c1 = arith.constant 1 : index
    %c0_17 = arith.constant 0 : index
    %20 = vector.load %arg7[%c1, %c0_17] : memref<72x256xf32, #tpu.memory_space<vmem>>, vector<56x256xf32>
    %c1_18 = arith.constant 1 : index
    %c0_19 = arith.constant 0 : index
    %c0_20 = arith.constant 0 : index
    %21 = vector.load %arg4[%c1_18, %c0_19, %c0_20] : memref<4x256x128xf32, #tpu.memory_space<vmem>>, vector<1x256x128xf32>
    %22 = vector.shape_cast %21 : vector<1x256x128xf32> to vector<256x128xf32>
    %cst_21 = arith.constant dense<0.000000e+00> : vector<56x128xf32>
    %23 = tpu.matmul %20, %22, %cst_21 {dimension_numbers = #tpu.dot_dimension_numbers<[1], [0], [0], [1], [0, 0, 1, 1], [], []>} : vector<56x256xf32>, vector<256x128xf32>, vector<56x128xf32> -> vector<56x128xf32>
    %24 = arith.addf %19, %23 : vector<56x128xf32>
    %c8 = arith.constant 8 : index
    %c0_22 = arith.constant 0 : index
    %25 = vector.load %arg7[%c8, %c0_22] : memref<72x256xf32, #tpu.memory_space<vmem>>, vector<56x256xf32>
    %c2 = arith.constant 2 : index
    %c0_23 = arith.constant 0 : index
    %c0_24 = arith.constant 0 : index
    %26 = vector.load %arg4[%c2, %c0_23, %c0_24] : memref<4x256x128xf32, #tpu.memory_space<vmem>>, vector<1x256x128xf32>
    %27 = vector.shape_cast %26 : vector<1x256x128xf32> to vector<256x128xf32>
    %cst_25 = arith.constant dense<0.000000e+00> : vector<56x128xf32>
    %28 = tpu.matmul %25, %27, %cst_25 {dimension_numbers = #tpu.dot_dimension_numbers<[1], [0], [0], [1], [0, 0, 1, 1], [], []>} : vector<56x256xf32>, vector<256x128xf32>, vector<56x128xf32> -> vector<56x128xf32>
    %29 = arith.addf %24, %28 : vector<56x128xf32>
    %c9 = arith.constant 9 : index
    %c0_26 = arith.constant 0 : index
    %30 = vector.load %arg7[%c9, %c0_26] : memref<72x256xf32, #tpu.memory_space<vmem>>, vector<56x256xf32>
    %c3 = arith.constant 3 : index
    %c0_27 = arith.constant 0 : index
    %c0_28 = arith.constant 0 : index
    %31 = vector.load %arg4[%c3, %c0_27, %c0_28] : memref<4x256x128xf32, #tpu.memory_space<vmem>>, vector<1x256x128xf32>
    %32 = vector.shape_cast %31 : vector<1x256x128xf32> to vector<256x128xf32>
    %cst_29 = arith.constant dense<0.000000e+00> : vector<56x128xf32>
    %33 = tpu.matmul %30, %32, %cst_29 {dimension_numbers = #tpu.dot_dimension_numbers<[1], [0], [0], [1], [0, 0, 1, 1], [], []>} : vector<56x256xf32>, vector<256x128xf32>, vector<56x128xf32> -> vector<56x128xf32>
    %34 = arith.addf %29, %33 : vector<56x128xf32>
    %c0_30 = arith.constant 0 : index
    %c0_31 = arith.constant 0 : index
    %35 = vector.load %arg5[%c0_30, %c0_31] : memref<1x128xf32, #tpu.memory_space<vmem>>, vector<1x128xf32>
    %36 = vector.broadcast %35 : vector<1x128xf32> to vector<56x128xf32>
    %37 = arith.addf %34, %36 : vector<56x128xf32>
    %cst_32 = arith.constant 0.000000e+00 : f32
    %38 = vector.broadcast %cst_32 : f32 to vector<56x128xf32>
    %39 = arith.cmpf ogt, %37, %38 : vector<56x128xf32>
    %cst_33 = arith.constant 0.000000e+00 : f32
    %40 = vector.broadcast %cst_33 : f32 to vector<56x128xf32>
    %41 = arith.minimumf %37, %40 : vector<56x128xf32>
    %42 = math.exp %41 : vector<56x128xf32>
    %cst_34 = arith.constant 1.000000e+00 : f32
    %43 = vector.broadcast %cst_34 : f32 to vector<56x128xf32>
    %44 = arith.subf %42, %43 : vector<56x128xf32>
    %45 = arith.select %39, %37, %44 : vector<56x128xi1>, vector<56x128xf32>
    %c0_35 = arith.constant 0 : index
    %c0_36 = arith.constant 0 : index
    %c0_37 = arith.constant 0 : index
    %46 = vector.load %arg6[%c0_35, %c0_36, %c0_37] : memref<1x56x128xf32, #tpu.memory_space<vmem>>, vector<1x56x128xf32>
    %47 = vector.shape_cast %46 : vector<1x56x128xf32> to vector<56x128xf32>
    %48 = vector.shape_cast %45 : vector<56x128xf32> to vector<1x56x128xf32>
    tpu.vector_store %arg6[%c0_35, %c0_36, %c0_37], %48 {strides = array<i32>} : memref<1x56x128xf32, #tpu.memory_space<vmem>>, vector<1x56x128xf32>,
    return
  }
  func.func @transform_0(%arg0: i32) -> (i32, i32, i32) {
    %c0_i32 = arith.constant 0 : i32
    %c0_i32_0 = arith.constant 0 : i32
    %c0_i32_1 = arith.constant 0 : i32
    return %arg0, %c0_i32, %c0_i32_0 : i32, i32, i32
  }
  func.func @transform_1(%arg0: i32) -> (i32, i32) {
    %c0_i32 = arith.constant 0 : i32
    %c0_i32_0 = arith.constant 0 : i32
    %c0_i32_1 = arith.constant 0 : i32
    return %c0_i32, %c0_i32_0 : i32, i32
  }
  func.func @transform_2(%arg0: i32) -> (i32, i32) {
    %c0_i32 = arith.constant 0 : i32
    %c0_i32_0 = arith.constant 0 : i32
    %c0_i32_1 = arith.constant 0 : i32
    return %c0_i32, %c0_i32_0 : i32, i32
  }
  func.func @transform_3(%arg0: i32) -> (i32, i32, i32) {
    %c0_i32 = arith.constant 0 : i32
    %c0_i32_0 = arith.constant 0 : i32
    %c0_i32_1 = arith.constant 0 : i32
    %c0_i32_2 = arith.constant 0 : i32
    return %c0_i32, %c0_i32_0, %c0_i32_1 : i32, i32, i32
  }
  func.func @transform_4(%arg0: i32) -> (i32, i32) {
    %c0_i32 = arith.constant 0 : i32
    %c0_i32_0 = arith.constant 0 : i32
    %c0_i32_1 = arith.constant 0 : i32
    return %c0_i32, %c0_i32_0 : i32, i32
  }
  func.func @transform_5(%arg0: i32) -> (i32, i32, i32) {
    %c0_i32 = arith.constant 0 : i32
    %c0_i32_0 = arith.constant 0 : i32
    %c0_i32_1 = arith.constant 0 : i32
    return %arg0, %c0_i32, %c0_i32_0 : i32, i32, i32
  }
}

</mosaic_0001>

<bundles_post_ra>
// kernel: tile.8
= control target key start
LH: loop header
LB: loop body
LE: loop exit
PB: predicated region body
PF: predicated region fallthrough
CT: control target
= control target key end

     0   :  { %s22_s0 = inlined_call_operand.vmem [shape: f32[64], index: 0, kind: input, shape index: {}]   ;;  %s23_s1 = inlined_call_operand.vmem [shape: f32[4,64], index: 1, kind: output, shape index: {}]  }
   0x1   :  { %v4_v0 = vld [vmem:[%s22_s0] ss:$0 sm:$0xff] }
   0x2   :  { %5 = vst [vmem:[%s23_s1] sm:$0xf] %v4_v0 }

// kernel: tile.9
= control target key start
LH: loop header
LB: loop body
LE: loop exit
PB: predicated region body
PF: predicated region fallthrough
CT: control target
= control target key end

     0   :  { %s6_s8 = smov 3  ;;  %vm8_vm0 = vcmask 523264   ;;  %s30_s9 = smov 64   ;;  %vm15_vm1 = vcmask 1048064   ;;  %s50_s0 = inlined_call_operand.vmem [shape: f32[4,64], index: 0, kind: input, shape index: {}]   ;;  %s51_s1 = inlined_call_operand.vmem [shape: f32[1,256], index: 1, kind: output, shape index: {}]  }
   0x1   :  { %v4_v0 = vld [vmem:[%s50_s0] sm:$0xf]  ;;  %s11_s0 = smov 3 }
   0x2   :  { %5 = vst [vmem:[#allocation1] sm:$0xf] %v4_v0 }
   0x9   :  { %v12_v1 = vld [vmem:[#allocation1 + $0x1] ss:$2 sm:%s11_s0]   ;;  %v7_v2 = vld [vmem:[#allocation1] ss:$2 sm:%s6_s8]  }
   0xa   :  { %13 = vrot.lane.b32.xlu0 %v12_v1, %s30_s9  ;;  %9 = vst.msk [vmem:[#allocation0] ss:$8 sm:$0x3] %vm8_vm0, %v7_v2  }
  0x7c   :  { %v14_v3 = vpop.permute.xlu0 %13  }
  0x7d   :  { %16 = vst.msk [vmem:[#allocation0] ss:$8 sm:$0x3] %vm15_vm1, %v14_v3  }
  0x84   :  { %v20_v4 = vld [vmem:[#allocation0] sm:$0x1]  ;;  %v24_v5 = vld [vmem:[#allocation0 + $0x8] sm:$0x1] }
  0x85   :  { %22 = vst [vmem:[%s51_s1] sm:$0x1] %v20_v4  ;;  %28 = vst [vmem:[%s51_s1 + $0x1] sm:$0x1] %v24_v5 }

// kernel: conv_layers_forward.1
= control target key start
LH: loop header
LB: loop body
LE: loop exit
PB: predicated region body
PF: predicated region fallthrough
CT: control target
= control target key end

     0   :  { %s2038_s18 = smov 0   ;;  %s3066_s0 = inlined_call_operand.vmem [shape: f32[2,72,192], index: 0, kind: input, shape index: {}]   ;;  %s3067_s1 = inlined_call_operand.vmem [shape: f32[192,256], index: 1, kind: input, shape index: {}]   ;;  %s3068_s2 = inlined_call_operand.vmem [shape: f32[1,256], index: 2, kind: input, shape index: {}]   ;;  %s3069_s3 = inlined_call_operand.vmem [shape: f32[4,256,128], index: 3, kind: input, shape index: {}]   ;;  %s3070_s4 = inlined_call_operand.vmem [shape: f32[1,128], index: 4, kind: input, shape index: {}]   ;;  %s3071_s5 = inlined_call_operand.vmem [shape: f32[2,56,128], index: 5, kind: output, shape index: {}]  }
   0x1 LB: > { %s1396_s19 = sadd.s32 4294967295, %s2006_s18   ;;  %p1400_p0 = scmp.ge.s32.totalorder %s2006_s18, 1  ;;  %s2006_s18 = sphi %s2038_s18, %s15_s18  }
   0x2   : > { %p187_p1 = scmp.lt.s32.totalorder %s2006_s18, 3 }
   0x4   : > { %p188_p2 = pnand %p1400_p0, %p187_p1 }
   0x5   : > { %v244_v0 = vld [vmem:[%s3067_s1 + $0x8] sm:$0xff] (!%p188_p2)  ;;  %v246_v1 = vld [vmem:[%s3067_s1 + $0x18] sm:$0xff] (!%p188_p2)  ;;  %v243_v2 = vld [vmem:[%s3067_s1] sm:$0xff] (!%p188_p2)  ;;  %p2064_p3 = scmp.lt.s32.totalorder (!%p188_p2), %s1396_s19, 1  ;;  %vm303_vm0 = vcmask (!%p188_p2), 523264   ;;  %vm675_vm5 = vcmask (!%p188_p2), 1046528  }
   0x6   : > { %191 = sbr.rel (%p188_p2) target bundleno = 624 (0x270), region = 40  ;;  %v1748_v3 = vpack.c.bf16 (!%p188_p2), %v246_v1, %v244_v0  ;;  %v245_v4 = vld [vmem:[%s3067_s1 + $0x10] sm:$0xff] (!%p188_p2)  ;;  %v248_v5 = vld [vmem:[%s3067_s1 + $0x28] sm:$0xff] (!%p188_p2)  ;;  %v250_v6 = vld [vmem:[%s3067_s1 + $0x38] sm:$0xff] (!%p188_p2) }
   0x7   : > { %v1750_v7 = vpack.c.bf16 (!%p188_p2), %v245_v4, %v243_v2  ;;  %v1752_v8 = vpack.c.bf16 (!%p188_p2), %v250_v6, %v248_v5  ;;  %v247_v9 = vld [vmem:[%s3067_s1 + $0x20] sm:$0xff] (!%p188_p2)  ;;  %v249_v10 = vld [vmem:[%s3067_s1 + $0x30] sm:$0xff] (!%p188_p2)  ;;  %v252_v11 = vld [vmem:[%s3067_s1 + $0x48] sm:$0xff] (!%p188_p2) }
   0x8   : > { %1749 = vmatprep.subr.bf16.mxu0 (!%p188_p2), %v1748_v3  ;;  %v254_v12 = vld [vmem:[%s3067_s1 + $0x58] sm:$0xff] (!%p188_p2)  ;;  %v1754_v13 = vpack.c.bf16 (!%p188_p2), %v249_v10, %v247_v9  ;;  %v251_v15 = vld [vmem:[%s3067_s1 + $0x40] sm:$0xff] (!%p188_p2)  ;;  %v253_v16 = vld [vmem:[%s3067_s1 + $0x50] sm:$0xff] (!%p188_p2) }
   0x9   : > { %1751 = vmatpush1.bf16.msra.mxu0 (!%p188_p2), %v1750_v7  ;;  %v1756_v14 = vpack.c.bf16 (!%p188_p2), %v254_v12, %v252_v11  ;;  %v256_v17 = vld [vmem:[%s3067_s1 + $0x68] sm:$0xff] (!%p188_p2)  ;;  %v258_v18 = vld [vmem:[%s3067_s1 + $0x78] sm:$0xff] (!%p188_p2)  ;;  %v1758_v19 = vpack.c.bf16 (!%p188_p2), %v253_v16, %v251_v15  ;;  %v255_v21 = vld [vmem:[%s3067_s1 + $0x60] sm:$0xff] (!%p188_p2) }
   0xa   : > { %1753 = vmatprep.subr.bf16.mxu0 (!%p188_p2), %v1752_v8  ;;  %v1760_v20 = vpack.c.bf16 (!%p188_p2), %v258_v18, %v256_v17  ;;  %v257_v22 = vld [vmem:[%s3067_s1 + $0x70] sm:$0xff] (!%p188_p2)  ;;  %v260_v23 = vld [vmem:[%s3067_s1 + $0x88] sm:$0xff] (!%p188_p2)  ;;  %v262_v24 = vld [vmem:[%s3067_s1 + $0x98] sm:$0xff] (!%p188_p2) }
   0xb   : > { %v1762_v25 = vpack.c.bf16 (!%p188_p2), %v257_v22, %v255_v21  ;;  %v1764_v26 = vpack.c.bf16 (!%p188_p2), %v262_v24, %v260_v23  ;;  %v259_v27 = vld [vmem:[%s3067_s1 + $0x80] sm:$0xff] (!%p188_p2)  ;;  %v261_v28 = vld [vmem:[%s3067_s1 + $0x90] sm:$0xff] (!%p188_p2)  ;;  %v264_v29 = vld [vmem:[%s3067_s1 + $0xa8] sm:$0xff] (!%p188_p2) }
   0xc   : > { %v266_v30 = vld [vmem:[%s3067_s1 + $0xb8] sm:$0xff] (!%p188_p2)  ;;  %v1766_v31 = vpack.c.bf16 (!%p188_p2), %v261_v28, %v259_v27  ;;  %v263_v34 = vld [vmem:[%s3067_s1 + $0xa0] sm:$0xff] (!%p188_p2)  ;;  %v265_v35 = vld [vmem:[%s3067_s1 + $0xb0] sm:$0xff] (!%p188_p2) }
   0xd   : > { %s3075_s19 = smov (!%p2064_p3, %s1396_s19), 1  ;;  %1755 = vmatpush1.bf16.msra.mxu0 %v1754_v13  ;;  %v1768_v33 = vpack.c.bf16 %v266_v30, %v264_v29  ;;  %v268_v36 = vld [vmem:[%s3067_s1 + $0xc8] sm:$0xff]  ;;  %v270_v37 = vld [vmem:[%s3067_s1 + $0xd8] sm:$0xff]  ;;  %v1770_v38 = vpack.c.bf16 %v265_v35, %v263_v34  ;;  %v267_v40 = vld [vmem:[%s3067_s1 + $0xc0] sm:$0xff] }
   0xe   : > { %1757 = vmatprep.subr.bf16.mxu0 %v1756_v14  ;;  %s1940_s30 = smul.u32 144, %s3075_s19  ;;  %v1772_v39 = vpack.c.bf16 %v270_v37, %v268_v36  ;;  %v269_v41 = vld [vmem:[%s3067_s1 + $0xd0] sm:$0xff]  ;;  %v272_v42 = vld [vmem:[%s3067_s1 + $0xe8] sm:$0xff]  ;;  %v274_v43 = vld [vmem:[%s3067_s1 + $0xf8] sm:$0xff] }
   0xf   : > { %v1774_v44 = vpack.c.bf16 %v269_v41, %v267_v40  ;;  %v1776_v45 = vpack.c.bf16 %v274_v43, %v272_v42  ;;  %v271_v46 = vld [vmem:[%s3067_s1 + $0xe0] sm:$0xff]  ;;  %v273_v47 = vld [vmem:[%s3067_s1 + $0xf0] sm:$0xff]  ;;  %v276_v48 = vld [vmem:[%s3067_s1 + $0x108] sm:$0xff]  ;;  %s1941_s13 = smul.u32 56, %s3075_s19 }
  0x10   : > { %s2118_s16 = scalar_lea.vmem %s3066_s0, %s1940_s30  ;;  %v278_v49 = vld [vmem:[%s3067_s1 + $0x118] sm:$0xff]  ;;  %v1778_v50 = vpack.c.bf16 %v273_v47, %v271_v46  ;;  %v275_v52 = vld [vmem:[%s3067_s1 + $0x100] sm:$0xff]  ;;  %v277_v53 = vld [vmem:[%s3067_s1 + $0x110] sm:$0xff] }
  0x11   : > { %1759 = vmatpush1.bf16.msra.mxu0 %v1758_v19  ;;  %v226_v32 = vld [vmem:[%s2118_s16 + $0x8] sm:$0xff]  ;;  %v1780_v51 = vpack.c.bf16 %v278_v49, %v276_v48  ;;  %v282_v55 = vld [vmem:[%s3067_s1 + $0x138] sm:$0xff]  ;;  %v1782_v56 = vpack.c.bf16 %v277_v53, %v275_v52  ;;  %v279_v58 = vld [vmem:[%s3067_s1 + $0x120] sm:$0xff]  ;;  %s3048_s15 = scalar_lea.vmem %s3071_s5, %s1941_s13 }
  0x12   : > { %1761 = vmatprep.subr.bf16.mxu0 %v1760_v20  ;;  %1403 = vmatprep.mubr.msk.f32.mxu0 %vm303_vm0, %v226_v32  ;;  %v280_v54 = vld [vmem:[%s3067_s1 + $0x128] sm:$0xff]  ;;  %v281_v59 = vld [vmem:[%s3067_s1 + $0x130] sm:$0xff]  ;;  %v286_v61 = vld [vmem:[%s3067_s1 + $0x158] sm:$0xff] }
  0x13   : > { %v1784_v57 = vpack.c.bf16 %v282_v55, %v280_v54  ;;  %v284_v60 = vld [vmem:[%s3067_s1 + $0x148] sm:$0xff]  ;;  %v1786_v62 = vpack.c.bf16 %v281_v59, %v279_v58  ;;  %v283_v0 = vld [vmem:[%s3067_s1 + $0x140] sm:$0xff]  ;;  %v285_v1 = vld [vmem:[%s3067_s1 + $0x150] sm:$0xff] }
  0x14   : > { %v1788_v63 = vpack.c.bf16 %v286_v61, %v284_v60  ;;  %v288_v2 = vld [vmem:[%s3067_s1 + $0x168] sm:$0xff]  ;;  %v290_v3 = vld [vmem:[%s3067_s1 + $0x178] sm:$0xff]  ;;  %v1790_v4 = vpack.c.bf16 %v285_v1, %v283_v0  ;;  %v287_v6 = vld [vmem:[%s3067_s1 + $0x160] sm:$0xff] }
  0x15   : > { %1763 = vmatpush1.bf16.msra.mxu0 %v1762_v25  ;;  %v1792_v5 = vpack.c.bf16 %v290_v3, %v288_v2  ;;  %v289_v7 = vld [vmem:[%s3067_s1 + $0x170] sm:$0xff]  ;;  %v225_v9 = vld [vmem:[%s2118_s16] sm:$0xff]  ;;  %v228_v10 = vld [vmem:[%s2118_s16 + $0x18] sm:$0xff] }
  0x16   : > { %1765 = vmatprep.subr.bf16.mxu0 %v1764_v26  ;;  %v1794_v8 = vpack.c.bf16 %v289_v7, %v287_v6  ;;  %v227_v11 = vld [vmem:[%s2118_s16 + $0x10] sm:$0xff]  ;;  %v230_v12 = vld [vmem:[%s2118_s16 + $0x28] sm:$0xff]  ;;  %v229_v13 = vld [vmem:[%s2118_s16 + $0x20] sm:$0xff] }
  0x17   : > { %v232_v14 = vld [vmem:[%s2118_s16 + $0x38] sm:$0xff]  ;;  %v231_v15 = vld [vmem:[%s2118_s16 + $0x30] sm:$0xff]  ;;  %v234_v16 = vld [vmem:[%s2118_s16 + $0x48] sm:$0xff] }
  0x18   : > { %v233_v17 = vld [vmem:[%s2118_s16 + $0x40] sm:$0xff]  ;;  %v236_v18 = vld [vmem:[%s2118_s16 + $0x58] sm:$0xff]  ;;  %v235_v19 = vld [vmem:[%s2118_s16 + $0x50] sm:$0xff] }
  0x19   : > { %1767 = vmatpush1.bf16.msra.mxu0 %v1766_v31  ;;  %v238_v20 = vld [vmem:[%s2118_s16 + $0x68] sm:$0xff]  ;;  %v237_v21 = vld [vmem:[%s2118_s16 + $0x60] sm:$0xff]  ;;  %v240_v22 = vld [vmem:[%s2118_s16 + $0x78] sm:$0xff] }
  0x1a   : > { %1769 = vmatprep.subr.bf16.mxu0 %v1768_v33  ;;  %v239_v23 = vld [vmem:[%s2118_s16 + $0x70] sm:$0xff]  ;;  %v242_v24 = vld [vmem:[%s2118_s16 + $0x88] sm:$0xff]  ;;  %v241_v25 = vld [vmem:[%s2118_s16 + $0x80] sm:$0xff] }
  0x1b   : > { %v1478_v26 = vld [vmem:[%s3069_s3 + $0x280] sm:$0xff]  ;;  %v1479_v27 = vld [vmem:[%s3069_s3 + $0x288] sm:$0xff]  ;;  %v1480_v32 = vld [vmem:[%s3069_s3 + $0x290] sm:$0xff] }
  0x1c   : > { %v1860_v28 = vpack.c.bf16 %v1479_v27, %v1478_v26  ;;  %v1462_v29 = vld [vmem:[%s3069_s3 + $0x200] sm:$0xff]  ;;  %v1463_v30 = vld [vmem:[%s3069_s3 + $0x208] sm:$0xff]  ;;  %v1481_v33 = vld [vmem:[%s3069_s3 + $0x298] sm:$0xff] }
  0x1d   : > { %1771 = vmatpush1.bf16.msra.mxu0 %v1770_v38  ;;  %v1862_v31 = vpack.c.bf16 %v1463_v30, %v1462_v29  ;;  %v1864_v34 = vpack.c.bf16 %v1481_v33, %v1480_v32  ;;  %v1464_v35 = vld [vmem:[%s3069_s3 + $0x210] sm:$0xff]  ;;  %v1465_v36 = vld [vmem:[%s3069_s3 + $0x218] sm:$0xff]  ;;  %v1446_v38 = vld [vmem:[%s3069_s3 + $0x180] sm:$0xff] }
  0x1e   : > { %1773 = vmatprep.subr.bf16.mxu0 %v1772_v39  ;;  %v1866_v37 = vpack.c.bf16 %v1465_v36, %v1464_v35  ;;  %v1447_v39 = vld [vmem:[%s3069_s3 + $0x188] sm:$0xff]  ;;  %v1430_v41 = vld [vmem:[%s3069_s3 + $0x100] sm:$0xff]  ;;  %v1432_v53 = vld [vmem:[%s3069_s3 + $0x110] sm:$0xff] }
  0x1f   : > { %v1796_v40 = vpack.c.bf16 %v1447_v39, %v1446_v38  ;;  %v1431_v42 = vld [vmem:[%s3069_s3 + $0x108] sm:$0xff]  ;;  %v1482_v43 = vld [vmem:[%s3069_s3 + $0x2a0] sm:$0xff]  ;;  %v1433_v54 = vld [vmem:[%s3069_s3 + $0x118] sm:$0xff] }
  0x20   : > { %v1466_v46 = vld [vmem:[%s3069_s3 + $0x220] sm:$0xff]  ;;  %v1467_v47 = vld [vmem:[%s3069_s3 + $0x228] sm:$0xff]  ;;  %v1484_v55 = vld [vmem:[%s3069_s3 + $0x2b0] sm:$0xff] }
  0x21   : > { %1775 = vmatpush1.bf16.msra.mxu0 %v1774_v44  ;;  %v1798_v44 = vpack.c.bf16 %v1431_v42, %v1430_v41  ;;  %1797 = vmatprep.subr.bf16.mxu1 %v1796_v40  ;;  %v1870_v49 = vpack.c.bf16 %v1467_v47, %v1466_v46  ;;  %v1468_v58 = vld [vmem:[%s3069_s3 + $0x230] sm:$0xff]  ;;  %v1469_v59 = vld [vmem:[%s3069_s3 + $0x238] sm:$0xff]  ;;  %v1434_v1 = vld [vmem:[%s3069_s3 + $0x120] sm:$0xff] }
  0x22   : > { %1777 = vmatprep.subr.bf16.mxu0 %v1776_v45  ;;  %v1483_v45 = vld [vmem:[%s3069_s3 + $0x2a8] sm:$0xff]  ;;  %v1874_v61 = vpack.c.bf16 %v1469_v59, %v1468_v58  ;;  %v1486_v3 = vld [vmem:[%s3069_s3 + $0x2c0] sm:$0xff]  ;;  %v1457_v35 = vld [vmem:[%s3069_s3 + $0x1d8] sm:$0xff] }
  0x23   : > { %v1868_v48 = vpack.c.bf16 %v1483_v45, %v1482_v43  ;;  %1799 = vmatpush3.bf16.msra.mxu1 %v1798_v44  ;;  %v1435_v2 = vld [vmem:[%s3069_s3 + $0x128] sm:$0xff]  ;;  %v1470_v6 = vld [vmem:[%s3069_s3 + $0x240] sm:$0xff]  ;;  %v1441_v38 = vld [vmem:[%s3069_s3 + $0x158] sm:$0xff] }
  0x24   : > { %v1471_v7 = vld [vmem:[%s3069_s3 + $0x248] sm:$0xff]  ;;  %v1490_v27 = vld [vmem:[%s3069_s3 + $0x2e0] sm:$0xff]  ;;  %v1492_v39 = vld [vmem:[%s3069_s3 + $0x2f0] sm:$0xff] }
  0x25   : > { %1779 = vmatpush1.bf16.msra.mxu0 %v1778_v50  ;;  %v1448_v50 = vld [vmem:[%s3069_s3 + $0x190] sm:$0xff]  ;;  %v1439_v26 = vld [vmem:[%s3069_s3 + $0x148] sm:$0xff]  ;;  %v1474_v30 = vld [vmem:[%s3069_s3 + $0x260] sm:$0xff] }
  0x26   : > { %1781 = vmatprep.subr.bf16.mxu0 %v1780_v51  ;;  %v1449_v51 = vld [vmem:[%s3069_s3 + $0x198] sm:$0xff]  ;;  %v1491_v29 = vld [vmem:[%s3069_s3 + $0x2e8] sm:$0xff]  ;;  %v1476_v42 = vld [vmem:[%s3069_s3 + $0x270] sm:$0xff] }
  0x27   : > { %v1800_v52 = vpack.c.bf16 %v1449_v51, %v1448_v50  ;;  %v1884_v32 = vpack.c.bf16 %v1491_v29, %v1490_v27  ;;  %v1493_v41 = vld [vmem:[%s3069_s3 + $0x2f8] sm:$0xff]  ;;  %v1458_v46 = vld [vmem:[%s3069_s3 + $0x1e0] sm:$0xff]  ;;  %v1459_v47 = vld [vmem:[%s3069_s3 + $0x1e8] sm:$0xff] }
  0x28   : > { %v1477_v43 = vld [vmem:[%s3069_s3 + $0x278] sm:$0xff]  ;;  %v1888_v44 = vpack.c.bf16 %v1493_v41, %v1492_v39  ;;  %v1443_v50 = vld [vmem:[%s3069_s3 + $0x168] sm:$0xff]  ;;  %v1510_v51 = vld [vmem:[%s3069_s3 + $0x380] sm:$0xff] }
  0x29   : > { %1783 = vmatpush1.bf16.msra.mxu0 %v1782_v56  ;;  %v1802_v56 = vpack.c.bf16 %v1433_v54, %v1432_v53  ;;  %1801 = vmatprep.subr.bf16.mxu1 %v1800_v52  ;;  %v1890_v45 = vpack.c.bf16 %v1477_v43, %v1476_v42  ;;  %v1511_v53 = vld [vmem:[%s3069_s3 + $0x388] sm:$0xff]  ;;  %v1444_v58 = vld [vmem:[%s3069_s3 + $0x170] sm:$0xff]  ;;  %v1445_v59 = vld [vmem:[%s3069_s3 + $0x178] sm:$0xff] }
  0x2a   : > { %1785 = vmatprep.subr.bf16.mxu0 %v1784_v57  ;;  %v1485_v57 = vld [vmem:[%s3069_s3 + $0x2b8] sm:$0xff]  ;;  %v2417_v54 = vpack.c.bf16 %v1511_v53, %v1510_v51  ;;  %v2520_v41 = vld [vmem:[%s3069_s3 + $0x10] sm:$0xff]  ;;  %v2549_v53 = vld [vmem:[%s3069_s3 + $0xa0] sm:$0xff] }
  0x2b   : > { %v1872_v60 = vpack.c.bf16 %v1485_v57, %v1484_v55  ;;  %1803 = vmatpush3.bf16.msra.mxu1 %v1802_v56  ;;  %v1460_v55 = vld [vmem:[%s3069_s3 + $0x1f0] sm:$0xff]  ;;  %v1461_v56 = vld [vmem:[%s3069_s3 + $0x1f8] sm:$0xff] }
  0x2c   : > { %v1824_v57 = vpack.c.bf16 %v1461_v56, %v1460_v55  ;;  %v1497_v29 = vld [vmem:[%s3069_s3 + $0x318] sm:$0xff]  ;;  %v2554_v55 = vld [vmem:[%s3069_s3 + $0xa8] sm:$0xff] }
  0x2d   : > { %1787 = vmatpush1.bf16.msra.mxu0 %v1786_v62  ;;  %v1450_v62 = vld [vmem:[%s3069_s3 + $0x1a0] sm:$0xff]  ;;  %v2525_v42 = vld [vmem:[%s3069_s3 + $0x18] sm:$0xff] }
  0x2e   : > { %1789 = vmatprep.subr.bf16.mxu0 %v1788_v63  ;;  %v1451_v63 = vld [vmem:[%s3069_s3 + $0x1a8] sm:$0xff]  ;;  %v1501_v56 = vld [vmem:[%s3069_s3 + $0x338] sm:$0xff] }
  0x2f   : > { %v1804_v0 = vpack.c.bf16 %v1451_v63, %v1450_v62  ;;  %v607_v62 = vld [vmem:[%s3069_s3 + $0x88] sm:$0xff] }
  0x31   : > { %1791 = vmatpush1.bf16.msra.mxu0 %v1790_v4  ;;  %v1806_v4 = vpack.c.bf16 %v1435_v2, %v1434_v1  ;;  %1805 = vmatprep.subr.bf16.mxu1 %v1804_v0  ;;  %v293_v0 = vlaneseq }
  0x32   : > { %1793 = vmatprep.subr.bf16.mxu0 %v1792_v5  ;;  %v1487_v5 = vld [vmem:[%s3069_s3 + $0x2c8] sm:$0xff] }
  0x33   : > { %1807 = vmatpush3.bf16.msra.mxu1 %v1806_v4  ;;  %v294_v1 = vshrl.u32 %v293_v0, 7  ;;  %v1518_v0 = vld [vmem:[%s3069_s3 + $0x3c0] sm:$0xff] }
  0x35   : > { %1795 = vmatpush1.bf16.msra.mxu0 %v1794_v8  ;;  %v1876_v8 = vpack.c.bf16 %v1487_v5, %v1486_v3  ;;  %v295_v2 = vsub.s32 0, %v294_v1  ;;  %v291_v3 = vld [vmem:[%s3068_s2] sm:$0x3]  ;;  %v299_v4 = vsub.s32 1, %v294_v1 }
  0x36   : > { %1861 = vmatprep.subr.bf16.mxu0 %v1860_v28 }
  0x37   : > { %v2441_v5 = vrot.slane %v291_v3, %v295_v2 }
  0x38   : > { %396 = vmatmul.mubr.f32.vlgmr.msra.gmra.mrb[0].mxu0 %v225_v9  ;;  %v1878_v9 = vpack.c.bf16 %v1471_v7, %v1470_v6  ;;  %v2443_v6 = vrot.slane %v291_v3, %v299_v4  ;;  %v1834_v4 = vpack.c.bf16 %v2525_v42, %v2520_v41 }
  0x39   : > { %1404 = vmatprep.mubr.msk.f32.mxu0 %vm303_vm0, %v228_v10  ;;  %1863 = vmatpush3.bf16.msra.mxu0 %v1862_v31  ;;  %v1452_v10 = vld [vmem:[%s3069_s3 + $0x1b0] sm:$0xff]  ;;  %v1475_v31 = vld [vmem:[%s3069_s3 + $0x268] sm:$0xff] }
  0x3a   : > { %1865 = vmatprep.subr.bf16.mxu0 %v1864_v34  ;;  %v1886_v33 = vpack.c.bf16 %v1475_v31, %v1474_v30  ;;  %v1456_v34 = vld [vmem:[%s3069_s3 + $0x1d0] sm:$0xff]  ;;  %v1514_v30 = vld [vmem:[%s3069_s3 + $0x3a0] sm:$0xff]  ;;  %v1515_v31 = vld [vmem:[%s3069_s3 + $0x3a8] sm:$0xff] }
  0x3b   : > { %v1816_v36 = vpack.c.bf16 %v1457_v35, %v1456_v34  ;;  %v2501_v35 = vld [vmem:[%s3069_s3 + $0x90] sm:$0xff] }
  0x3c   : > { %402 = vmatmul.mubr.f32.gmra.mrb[2].mxu0 %v227_v11  ;;  %v1453_v11 = vld [vmem:[%s3069_s3 + $0x1b8] sm:$0xff] }
  0x3d   : > { %1405 = vmatprep.mubr.msk.f32.mxu0 %vm303_vm0, %v230_v12  ;;  %1867 = vmatpush3.bf16.msra.mxu0 %v1866_v37  ;;  %v1808_v12 = vpack.c.bf16 %v1453_v11, %v1452_v10  ;;  %v1440_v37 = vld [vmem:[%s3069_s3 + $0x150] sm:$0xff] }
  0x3e   : > { %1869 = vmatprep.subr.bf16.mxu0 %v1868_v48  ;;  %v1818_v40 = vpack.c.bf16 %v1441_v38, %v1440_v37  ;;  %v1820_v48 = vpack.c.bf16 %v1459_v47, %v1458_v46  ;;  %v1499_v37 = vld [vmem:[%s3069_s3 + $0x328] sm:$0xff]  ;;  %v1516_v46 = vld [vmem:[%s3069_s3 + $0x3b0] sm:$0xff]  ;;  %v1517_v47 = vld [vmem:[%s3069_s3 + $0x3b8] sm:$0xff] }
  0x3f   : > { %1809 = vmatprep.subr.bf16.mxu1 %v1808_v12 }
  0x40   : > { %408 = vmatmul.mubr.f32.gmra.mrb[4].mxu0 %v229_v13  ;;  %v1436_v13 = vld [vmem:[%s3069_s3 + $0x130] sm:$0xff] }
  0x41   : > { %1406 = vmatprep.mubr.msk.f32.mxu0 %vm303_vm0, %v232_v14  ;;  %1871 = vmatpush3.bf16.msra.mxu0 %v1870_v49  ;;  %v1437_v14 = vld [vmem:[%s3069_s3 + $0x138] sm:$0xff]  ;;  %v1442_v49 = vld [vmem:[%s3069_s3 + $0x160] sm:$0xff] }
  0x42   : > { %1873 = vmatprep.subr.bf16.mxu0 %v1872_v60  ;;  %v1822_v52 = vpack.c.bf16 %v1443_v50, %v1442_v49  ;;  %v1826_v60 = vpack.c.bf16 %v1445_v59, %v1444_v58 }
  0x44   : > { %414 = vmatmul.mubr.f32.gmra.mrb[6].mxu0 %v231_v15  ;;  %v1488_v15 = vld [vmem:[%s3069_s3 + $0x2d0] sm:$0xff] }
  0x45   : > { %1407 = vmatprep.mubr.msk.f32.mxu0 %vm303_vm0, %v234_v16  ;;  %1875 = vmatpush3.bf16.msra.mxu0 %v1874_v61  ;;  %v1810_v16 = vpack.c.bf16 %v1437_v14, %v1436_v13  ;;  %v606_v61 = vld [vmem:[%s3069_s3 + $0x80] sm:$0xff] }
  0x46   : > { %1877 = vmatprep.subr.bf16.mxu0 %v1876_v8  ;;  %v1828_v63 = vpack.c.bf16 %v607_v62, %v606_v61  ;;  %v2569_v62 = vld [vmem:[%s3069_s3 + $0x20] sm:$0xff] }
  0x47   : > { %1811 = vmatpush3.bf16.msra.mxu1 %v1810_v16 }
  0x48   : > { %420 = vmatmul.mubr.f32.gmra.mrb[8].mxu0 %v233_v17  ;;  %v1489_v17 = vld [vmem:[%s3069_s3 + $0x2d8] sm:$0xff] }
  0x49   : > { %1408 = vmatprep.mubr.msk.f32.mxu0 %vm303_vm0, %v236_v18  ;;  %1879 = vmatpush3.bf16.msra.mxu0 %v1878_v9  ;;  %v1472_v18 = vld [vmem:[%s3069_s3 + $0x250] sm:$0xff] }
  0x4c   : > { %426 = vmatmul.mubr.f32.gmra.mrb[10].mxu0 %v235_v19  ;;  %v1473_v19 = vld [vmem:[%s3069_s3 + $0x258] sm:$0xff] }
  0x4d   : > { %1409 = vmatprep.mubr.msk.f32.mxu0 %vm303_vm0, %v238_v20  ;;  %v1880_v20 = vpack.c.bf16 %v1489_v17, %v1488_v15 }
  0x4f   : > { %1881 = vmatprep.subr.bf16.mxu0 %v1880_v20  ;;  %v1495_v20 = vld [vmem:[%s3069_s3 + $0x308] sm:$0xff] }
  0x50   : > { %432 = vmatmul.mubr.f32.gmra.mrb[12].mxu0 %v237_v21  ;;  %v1882_v21 = vpack.c.bf16 %v1473_v19, %v1472_v18  ;;  %v1494_v19 = vld [vmem:[%s3069_s3 + $0x300] sm:$0xff] }
  0x51   : > { %1410 = vmatprep.mubr.msk.f32.mxu0 %vm303_vm0, %v240_v22  ;;  %v1454_v22 = vld [vmem:[%s3069_s3 + $0x1c0] sm:$0xff] }
  0x52   : > { %1883 = vmatpush3.bf16.msra.mxu0 %v1882_v21  ;;  %v2468_v21 = vld [vmem:[%s3069_s3] sm:$0xff] }
  0x53   : > { %1885 = vmatprep.subr.bf16.mxu0 %v1884_v32 }
  0x54   : > { %438 = vmatmul.mubr.f32.gmra.mrb[14].mxu0 %v239_v23  ;;  %v1455_v23 = vld [vmem:[%s3069_s3 + $0x1c8] sm:$0xff] }
  0x55   : > { %1411 = vmatprep.mubr.msk.f32.mxu0 %vm303_vm0, %v242_v24  ;;  %v1812_v24 = vpack.c.bf16 %v1455_v23, %v1454_v22  ;;  %v2473_v22 = vld [vmem:[%s3069_s3 + $0x8] sm:$0xff] }
  0x56   : > { %1887 = vmatpush3.bf16.msra.mxu0 %v1886_v33 }
  0x57   : > { %1813 = vmatprep.subr.bf16.mxu1 %v1812_v24  ;;  %1889 = vmatprep.subr.bf16.mxu0 %v1888_v44  ;;  %v1512_v24 = vld [vmem:[%s3069_s3 + $0x390] sm:$0xff]  ;;  %v2528_v44 = vpack.c.bf16 %v1495_v20, %v1494_v19 }
  0x58   : > { %444 = vmatmul.mubr.f32.gmra.mrb[16].mxu0 %v241_v25  ;;  %v1438_v25 = vld [vmem:[%s3069_s3 + $0x140] sm:$0xff] }
  0x59   : > { %v1814_v28 = vpack.c.bf16 %v1439_v26, %v1438_v25  ;;  %v1513_v25 = vld [vmem:[%s3069_s3 + $0x398] sm:$0xff]  ;;  %v1496_v26 = vld [vmem:[%s3069_s3 + $0x310] sm:$0xff] }
  0x5a   : > { %1891 = vmatpush3.bf16.msra.mxu0 %v1890_v45  ;;  %v1830_v45 = vpack.c.bf16 %v2473_v22, %v2468_v21  ;;  %v2542_v51 = vpack.c.bf16 %v1513_v25, %v1512_v24 }
  0x5b   : > { %1815 = vmatpush3.bf16.msra.mxu1 %v1814_v28  ;;  %1893 = vmatprep.subr.bf16.mxu0 %v2417_v54 }
  0x5c   : > { %1817 = vmatprep.subr.bf16.mxu1 %v1816_v36  ;;  %v1498_v36 = vld [vmem:[%s3069_s3 + $0x320] sm:$0xff] }
  0x5d   : > { %v2564_v61 = vpack.c.bf16 %v1499_v37, %v1498_v36 }
  0x5f   : > { %1819 = vmatpush3.bf16.msra.mxu1 %v1818_v40  ;;  %v2515_v40 = vld [vmem:[%s3069_s3 + $0x98] sm:$0xff] }
  0x60   : > { %1821 = vmatprep.subr.bf16.mxu1 %v1820_v48  ;;  %v1500_v48 = vld [vmem:[%s3069_s3 + $0x330] sm:$0xff]  ;;  %v1832_v3 = vpack.c.bf16 %v2515_v40, %v2501_v35 }
  0x61   : > { %v1520_v40 = vld [vmem:[%s3069_s3 + $0x3d0] sm:$0xff] }
  0x63   : > { %1823 = vmatpush3.bf16.msra.mxu1 %v1822_v52  ;;  %v2544_v52 = vpack.c.bf16 %v1497_v29, %v1496_v26 }
  0x64   : > { %1825 = vmatprep.subr.bf16.mxu1 %v1824_v57 }
  0x67   : > { %1827 = vmatpush3.bf16.msra.mxu1 %v1826_v60  ;;  %v2562_v60 = vpack.c.bf16 %v1515_v31, %v1514_v30 }
  0x68   : > { %1829 = vmatprep.subr.bf16.mxu1 %v1828_v63  ;;  %v2574_v63 = vld [vmem:[%s3069_s3 + $0x28] sm:$0xff] }
  0x69   : > { %v1838_v24 = vpack.c.bf16 %v2574_v63, %v2569_v62 }
 0x10b   : > { %v397_v7 = vpop.f32.mrb[0].mxu0 }
 0x10c   : > { %v2446_v8 = vadd.f32 %v397_v7, %v2441_v5  ;;  %v399_v9 = vpop.f32.mrb[1].mxu0  ;;  %v1519_v7 = vld [vmem:[%s3069_s3 + $0x3c8] sm:$0xff] }
 0x10d   : > { %v2449_v10 = vadd.f32 %v399_v9, %v2443_v6  ;;  %v1502_v9 = vld [vmem:[%s3069_s3 + $0x340] sm:$0xff]  ;;  %v2618_v29 = vpack.c.bf16 %v1519_v7, %v1518_v0 }
 0x10e   : > { %v468_v11 = vmin.f32 %v2446_v8, 0.0  ;;  %vm450_vm1 = vcmp.gt.f32.partialorder %v2446_v8, 0.0 }
 0x10f   : > { %v469_v12 = vmin.f32 %v2449_v10, 0.0  ;;  %v403_v13 = vpop.f32.mrb[2].mxu0  ;;  %vm451_vm2 = vcmp.gt.f32.partialorder %v2449_v10, 0.0 }
 0x110   : > { %v486_v14 = vmul.f32 1.442695, %v468_v11  ;;  %v2454_v15 = vadd.f32 %v403_v13, %v2441_v5  ;;  %v405_v16 = vpop.f32.mrb[3].mxu0  ;;  %v1503_v11 = vld [vmem:[%s3069_s3 + $0x348] sm:$0xff]  ;;  %v2596_v13 = vpack.c.bf16 %v1517_v47, %v1516_v46 }
 0x111   : > { %v488_v17 = vmul.f32 1.442695, %v469_v12  ;;  %v2457_v18 = vadd.f32 %v405_v16, %v2443_v6  ;;  %v2603_v16 = vld [vmem:[%s3069_s3 + $0xb0] sm:$0xff]  ;;  %v2620_v30 = vpack.c.bf16 %v1503_v11, %v1502_v9 }
 0x112   : > { %1950 = vpow2.f32 %v486_v14  ;;  %v470_v23 = vmin.f32 %v2454_v15, 0.0  ;;  %v2598_v14 = vpack.c.bf16 %v1501_v56, %v1500_v48  ;;  %vm452_vm3 = vcmp.gt.f32.partialorder %v2454_v15, 0.0 }
 0x113   : > { %1952 = vpow2.f32 %v488_v17  ;;  %v471_v27 = vmin.f32 %v2457_v18, 0.0  ;;  %v409_v28 = vpop.f32.mrb[4].mxu0  ;;  %v2608_v17 = vld [vmem:[%s3069_s3 + $0xb8] sm:$0xff]  ;;  %vm453_vm4 = vcmp.gt.f32.partialorder %v2457_v18, 0.0 }
 0x114   : > { %v490_v32 = vmul.f32 1.442695, %v470_v23  ;;  %v2496_v33 = vadd.f32 %v409_v28, %v2441_v5  ;;  %v411_v34 = vpop.f32.mrb[5].mxu0  ;;  %v1836_v23 = vpack.c.bf16 %v2554_v55, %v2549_v53  ;;  %v614_v55 = vld [vmem:[%s3069_s3 + $0xc0] sm:$0xff]  ;;  %v3073_v62 = vpack.c.bf16 %v2608_v17, %v2603_v16 }
 0x115   : > { %v492_v38 = vmul.f32 1.442695, %v471_v27  ;;  %v2510_v39 = vadd.f32 %v411_v34, %v2443_v6 }
 0x116   : > { %1954 = vpow2.f32 %v490_v32  ;;  %v472_v43 = vmin.f32 %v2496_v33, 0.0  ;;  %vm454_vm6 = vcmp.gt.f32.partialorder %v2496_v33, 0.0 }
 0x117   : > { %1956 = vpow2.f32 %v492_v38  ;;  %v473_v49 = vmin.f32 %v2510_v39, 0.0  ;;  %v415_v50 = vpop.f32.mrb[6].mxu0  ;;  %vm455_vm7 = vcmp.gt.f32.partialorder %v2510_v39, 0.0 }
 0x118   : > { %v494_v57 = vmul.f32 1.442695, %v472_v43  ;;  %v2560_v58 = vadd.f32 %v415_v50, %v2441_v5  ;;  %v417_v59 = vpop.f32.mrb[7].mxu0 }
 0x119   : > { %v496_v1 = vmul.f32 1.442695, %v473_v49  ;;  %v2580_v2 = vadd.f32 %v417_v59, %v2443_v6 }
 0x11a   : > { %1958 = vpow2.f32 %v494_v57  ;;  %v474_v12 = vmin.f32 %v2560_v58, 0.0  ;;  %vm456_vm8 = vcmp.gt.f32.partialorder %v2560_v58, 0.0 }
 0x11b   : > { %1960 = vpow2.f32 %v496_v1  ;;  %v475_v19 = vmin.f32 %v2580_v2, 0.0  ;;  %v421_v20 = vpop.f32.mrb[8].mxu0  ;;  %vm457_vm9 = vcmp.gt.f32.partialorder %v2580_v2, 0.0 }
 0x11c   : > { %v1951_v25 = vpop.eup %1950  ;;  %v498_v26 = vmul.f32 1.442695, %v474_v12  ;;  %v2616_v27 = vadd.f32 %v421_v20, %v2441_v5  ;;  %v423_v28 = vpop.f32.mrb[9].mxu0 }
 0x11d   : > { %v1953_v31 = vpop.eup %1952  ;;  %v1412_v32 = vadd.f32 -1.0, %v1951_v25  ;;  %v500_v34 = vmul.f32 1.442695, %v475_v19  ;;  %v2623_v36 = vadd.f32 %v423_v28, %v2443_v6 }
 0x11e   : > { %v1413_v38 = vadd.f32 -1.0, %v1953_v31  ;;  %1962 = vpow2.f32 %v498_v26  ;;  %v476_v43 = vmin.f32 %v2616_v27, 0.0  ;;  %vm458_vm10 = vcmp.gt.f32.partialorder %v2616_v27, 0.0 }
 0x11f   : > { %v2630_v46 = vsel %vm450_vm1, %v2446_v8, %v1412_v32  ;;  %1964 = vpow2.f32 %v500_v34  ;;  %v477_v47 = vmin.f32 %v2623_v36, 0.0  ;;  %v427_v48 = vpop.f32.mrb[10].mxu0  ;;  %vm459_vm11 = vcmp.gt.f32.partialorder %v2623_v36, 0.0 }
 0x120   : > { %v1955_v49 = vpop.eup %1954  ;;  %558 = vst [vmem:[#allocation2] sm:$0xff] %v2630_v46  ;;  %v2636_v50 = vsel %vm451_vm2, %v2449_v10, %v1413_v38  ;;  %v502_v56 = vmul.f32 1.442695, %v476_v43  ;;  %v2640_v57 = vadd.f32 %v427_v48, %v2441_v5  ;;  %v429_v8 = vpop.f32.mrb[11].mxu0 }
 0x121   : > { %v1957_v59 = vpop.eup %1956  ;;  %559 = vst [vmem:[#allocation2 + $0x8] sm:$0xff] %v2636_v50  ;;  %v1414_v0 = vadd.f32 -1.0, %v1955_v49  ;;  %v504_v1 = vmul.f32 1.442695, %v477_v47  ;;  %v2645_v7 = vadd.f32 %v429_v8, %v2443_v6 }
 0x122   : > { %v1415_v10 = vadd.f32 -1.0, %v1957_v59  ;;  %1966 = vpow2.f32 %v502_v56  ;;  %v478_v9 = vmin.f32 %v2640_v57, 0.0  ;;  %vm460_vm12 = vcmp.gt.f32.partialorder %v2640_v57, 0.0 }
 0x123   : > { %v2650_v11 = vsel %vm452_vm3, %v2454_v15, %v1414_v0  ;;  %1968 = vpow2.f32 %v504_v1  ;;  %v479_v12 = vmin.f32 %v2645_v7, 0.0  ;;  %v433_v19 = vpop.f32.mrb[12].mxu0  ;;  %vm461_vm13 = vcmp.gt.f32.partialorder %v2645_v7, 0.0 }
 0x124   : > { %v1959_v20 = vpop.eup %1958  ;;  %560 = vst [vmem:[#allocation2 + $0x10] sm:$0xff] %v2650_v11  ;;  %v2656_v25 = vsel %vm453_vm4, %v2457_v18, %v1415_v10  ;;  %v506_v26 = vmul.f32 1.442695, %v478_v9  ;;  %v2660_v28 = vadd.f32 %v433_v19, %v2441_v5  ;;  %v435_v15 = vpop.f32.mrb[13].mxu0 }
 0x125   : > { %v1961_v31 = vpop.eup %1960  ;;  %561 = vst [vmem:[#allocation2 + $0x18] sm:$0xff] %v2656_v25  ;;  %v1416_v32 = vadd.f32 -1.0, %v1959_v20  ;;  %v508_v34 = vmul.f32 1.442695, %v479_v12  ;;  %v2665_v38 = vadd.f32 %v435_v15, %v2443_v6  ;;  %1019 = vmatprep.mubr.f32.mxu0 %v2656_v25 }
 0x126   : > { %v1417_v18 = vadd.f32 -1.0, %v1961_v31  ;;  %1970 = vpow2.f32 %v506_v26  ;;  %v480_v43 = vmin.f32 %v2660_v28, 0.0  ;;  %1020 = vmatmul.mubr.f32.vlgmr.msra.gmra.mrb[18].mxu0 %v2650_v11  ;;  %vm462_vm14 = vcmp.gt.f32.partialorder %v2660_v28, 0.0 }
 0x127   : > { %v2674_v47 = vsel %vm454_vm6, %v2496_v33, %v1416_v32  ;;  %1972 = vpow2.f32 %v508_v34  ;;  %v481_v48 = vmin.f32 %v2665_v38, 0.0  ;;  %v439_v49 = vpop.f32.mrb[14].mxu0  ;;  %1895 = vmatpush3.bf16.msra.mxu0 %v2528_v44  ;;  %v622_v56 = vld [vmem:[#allocation2] sm:$0xfe]  ;;  %v680_v32 = vrot.slane %v2656_v25, 1 }
 0x128   : > { %v1963_v8 = vpop.eup %1962  ;;  %v2682_v59 = vsel %vm455_vm7, %v2510_v39, %v1417_v18  ;;  %v510_v0 = vmul.f32 1.442695, %v480_v43  ;;  %v2685_v1 = vadd.f32 %v439_v49, %v2441_v5  ;;  %v441_v33 = vpop.f32.mrb[15].mxu0  ;;  %v623_v10 = vld [vmem:[#allocation2 + $0x8] sm:$0xfe]  ;;  %v676_v9 = vrot.slane %v622_v56, 1  ;;  %1897 = vmatprep.subr.bf16.mxu0 %v2542_v51 }
 0x129   : > { %v1965_v12 = vpop.eup %1964  ;;  %v1418_v19 = vadd.f32 -1.0, %v1963_v8  ;;  %v512_v20 = vmul.f32 1.442695, %v481_v48  ;;  %v2689_v26 = vadd.f32 %v441_v33, %v2443_v6  ;;  %v679_v15 = vrot.slane %v623_v10, 1  ;;  %1024 = vmatprep.mubr.f32.mxu0 %v2682_v59 }
 0x12a   : > { %v1419_v39 = vadd.f32 -1.0, %v1965_v12  ;;  %1974 = vpow2.f32 %v510_v0  ;;  %v482_v31 = vmin.f32 %v2685_v1, 0.0  ;;  %1025 = vmatmul.mubr.f32.gmra.mrb[20].mxu0 %v2674_v47  ;;  %v677_v48 = vrot.slane %v2650_v11, 1 }
 0x12b   : > { %v2698_v34 = vsel %vm456_vm8, %v2560_v58, %v1418_v19  ;;  %1976 = vpow2.f32 %v512_v20  ;;  %v483_v18 = vmin.f32 %v2689_v26, 0.0  ;;  %v445_v43 = vpop.f32.mrb[16].mxu0  ;;  %1899 = vmatpush3.bf16.msra.mxu0 %v2544_v52  ;;  %v681_v33 = vsel %vm675_vm5, %v679_v15, %v680_v32 }
 0x12c   : > { %v1967_v49 = vpop.eup %1966  ;;  %v2706_v56 = vsel %vm457_vm9, %v2580_v2, %v1419_v39  ;;  %v514_v8 = vmul.f32 1.442695, %v482_v31  ;;  %v2709_v0 = vadd.f32 %v445_v43, %v2441_v5  ;;  %v447_v58 = vpop.f32.mrb[17].mxu0  ;;  %1901 = vmatprep.subr.bf16.mxu0 %v2562_v60  ;;  %784 = vmatprep.mubr.f32.mxu1 %v681_v33  ;;  %v678_v37 = vsel %vm675_vm5, %v676_v9, %v677_v48  ;;  %v597_v33 = vld [vmem:[%s3069_s3 + $0x38] sm:$0xff] }
 0x12d   : > { %v1969_v10 = vpop.eup %1968  ;;  %v1420_v12 = vadd.f32 -1.0, %v1967_v49  ;;  %v516_v19 = vmul.f32 1.442695, %v483_v18  ;;  %v2714_v20 = vadd.f32 %v447_v58, %v2443_v6  ;;  %1029 = vmatprep.mubr.f32.mxu0 %v2706_v56  ;;  %785 = vmatmul.mubr.f32.vlgmr.msra.gmra.mrb[0].mxu1 %v678_v37  ;;  %v2741_v31 = vrot.slane %v2674_v47, 1 }
 0x12e   : > { %v1421_v2 = vadd.f32 -1.0, %v1969_v10  ;;  %1978 = vpow2.f32 %v514_v8  ;;  %v484_v5 = vmin.f32 %v2709_v0, 0.0  ;;  %1030 = vmatmul.mubr.f32.gmra.mrb[22].mxu0 %v2698_v34  ;;  %1831 = vmatpush3.bf16.msra.mxu1 %v1830_v45  ;;  %v688_v18 = vrot.slane %v2706_v56, 1 }
 0x12f   : > { %v2724_v15 = vsel %vm458_vm10, %v2616_v27, %v1420_v12  ;;  %1980 = vpow2.f32 %v516_v19  ;;  %v485_v6 = vmin.f32 %v2714_v20, 0.0  ;;  %1903 = vmatpush3.bf16.msra.mxu0 %v2564_v61  ;;  %v2738_v27 = vrot.slane %v2682_v59, 1  ;;  %1833 = vmatprep.subr.bf16.mxu1 %v1832_v3  ;;  %v1521_v3 = vld [vmem:[%s3069_s3 + $0x3d8] sm:$0xff] }
 0x130   : > { %v1971_v9 = vpop.eup %1970  ;;  %v2735_v37 = vsel %vm459_vm11, %v2623_v36, %v1421_v2  ;;  %v518_v39 = vmul.f32 1.442695, %v484_v5  ;;  %1905 = vmatprep.subr.bf16.mxu0 %v2596_v13  ;;  %v686_v36 = vrot.slane %v2698_v34, 1  ;;  %v683_v35 = vsel %vm675_vm5, %v677_v48, %v2741_v31  ;;  %v1504_v2 = vld [vmem:[%s3069_s3 + $0x350] sm:$0xff] }
 0x131   : > { %v1973_v21 = vpop.eup %1972  ;;  %v1422_v22 = vadd.f32 -1.0, %v1971_v9  ;;  %v520_v45 = vmul.f32 1.442695, %v485_v6  ;;  %1034 = vmatprep.mubr.f32.mxu0 %v2735_v37  ;;  %v685_v49 = vsel %vm675_vm5, %v680_v32, %v2738_v27  ;;  %v2771_v32 = vsel %vm675_vm5, %v2738_v27, %v688_v18 }
 0x132   : > { %v1423_v43 = vadd.f32 -1.0, %v1973_v21  ;;  %1982 = vpow2.f32 %v518_v39  ;;  %1035 = vmatmul.mubr.f32.gmra.mrb[24].mxu0 %v2724_v15  ;;  %789 = vmatprep.mubr.f32.mxu1 %v685_v49  ;;  %v2775_v48 = vsel %vm675_vm5, %v2741_v31, %v686_v36  ;;  %v692_v41 = vrot.slane %v2735_v37, 1  ;;  %v2823_v21 = vld [vmem:[%s3069_s3 + $0x40] sm:$0xff] }
 0x133   : > { %v2764_v8 = vsel %vm460_vm12, %v2640_v57, %v1422_v22  ;;  %1984 = vpow2.f32 %v520_v45  ;;  %1835 = vmatpush3.bf16.msra.mxu1 %v1834_v4  ;;  %v690_v42 = vrot.slane %v2724_v15, 1  ;;  %v596_v4 = vld [vmem:[%s3069_s3 + $0x30] sm:$0xff]  ;;  %1907 = vmatpush3.bf16.msra.mxu0 %v2598_v14  ;;  %v2804_v19 = vpack.c.bf16 %v1521_v3, %v1520_v40  ;;  %v2828_v22 = vld [vmem:[%s3069_s3 + $0x48] sm:$0xff]  ;;  %v1505_v45 = vld [vmem:[%s3069_s3 + $0x358] sm:$0xff] }
 0x134   : > { %v1975_v58 = vpop.eup %1974  ;;  %v2780_v57 = vsel %vm461_vm13, %v2645_v7, %v1423_v43  ;;  %790 = vmatmul.mubr.f32.gmra.mrb[2].mxu1 %v683_v35  ;;  %1837 = vmatprep.subr.bf16.mxu1 %v1836_v23  ;;  %v694_v7 = vrot.slane %v2764_v8, 1  ;;  %v615_v23 = vld [vmem:[%s3069_s3 + $0xc8] sm:$0xff]  ;;  %v2810_v6 = vsel %vm675_vm5, %v688_v18, %v692_v41  ;;  %vm463_vm15 = vcmp.gt.f32.partialorder %v2665_v38, 0.0  ;;  %v1522_v49 = vld [vmem:[%s3069_s3 + $0x3e0] sm:$0xff]  ;;  %v616_v3 = vld [vmem:[%s3069_s3 + $0xd0] sm:$0xff] }
 0x135   : > { %v1977_v10 = vpop.eup %1976  ;;  %v1424_v12 = vadd.f32 -1.0, %v1975_v58  ;;  %794 = vmatprep.mubr.f32.mxu1 %v2771_v32  ;;  %v696_v53 = vrot.slane %v2780_v57, 1  ;;  %v2813_v9 = vsel %vm675_vm5, %v686_v36, %v690_v42  ;;  %1039 = vmatprep.mubr.f32.mxu0 %v2780_v57  ;;  %v1842_v36 = vpack.c.bf16 %v597_v33, %v596_v4  ;;  %v617_v58 = vld [vmem:[%s3069_s3 + $0xd8] sm:$0xff]  ;;  %v1506_v4 = vld [vmem:[%s3069_s3 + $0x360] sm:$0xff]  ;;  %v1507_v33 = vld [vmem:[%s3069_s3 + $0x368] sm:$0xff] }
 0x136   : > { %v1425_v5 = vadd.f32 -1.0, %v1977_v10  ;;  %1909 = vmatprep.subr.bf16.mxu0 %v2618_v29  ;;  %v2818_v39 = vsel %vm675_vm5, %v690_v42, %v694_v7  ;;  %1040 = vmatmul.mubr.f32.gmra.mrb[26].mxu0 %v2764_v8  ;;  %v1844_v63 = vpack.c.bf16 %v615_v23, %v614_v55  ;;  %v1846_v16 = vpack.c.bf16 %v2828_v22, %v2823_v21  ;;  %v1063_v23 = vld [vmem:[#allocation2 + $0x18] sm:$0xfe] }
 0x137   : > { %v2836_v18 = vsel %vm462_vm14, %v2660_v28, %v1424_v12  ;;  %1839 = vmatpush3.bf16.msra.mxu1 %v1838_v24  ;;  %v2844_v43 = vsel %vm675_vm5, %v692_v41, %v696_v53  ;;  %v1523_v28 = vld [vmem:[%s3069_s3 + $0x3e8] sm:$0xff]  ;;  %1911 = vmatpush3.bf16.msra.mxu0 %v2620_v30  ;;  %v2875_v42 = vpack.c.bf16 %v1505_v45, %v1504_v2  ;;  %vm464_vm0 = vcmp.gt.f32.partialorder %v2685_v1, 0.0  ;;  %v1525_v22 = vld [vmem:[%s3069_s3 + $0x3f8] sm:$0xff] }
 0x138   : > { %v1979_v35 = vpop.eup %1978  ;;  %v2853_v40 = vsel %vm463_vm15, %v2665_v38, %v1425_v5  ;;  %795 = vmatmul.mubr.f32.gmra.mrb[4].mxu1 %v2775_v48  ;;  %1841 = vmatprep.subr.bf16.mxu1 %v3073_v62  ;;  %v2860_v24 = vrot.slane %v2836_v18, 1  ;;  %v2890_v55 = vpack.c.bf16 %v1523_v28, %v1522_v49  ;;  %vm465_vm1 = vcmp.gt.f32.partialorder %v2689_v26, 0.0 }
 0x139   : > { %v1981_v38 = vpop.eup %1980  ;;  %v1426_v41 = vadd.f32 -1.0, %v1979_v35  ;;  %799 = vmatprep.mubr.f32.mxu1 %v2810_v6  ;;  %v2873_v17 = vrot.slane %v2853_v40, 1  ;;  %1044 = vmatprep.mubr.f32.mxu0 %v2853_v40  ;;  %v1848_v21 = vpack.c.bf16 %v617_v58, %v616_v3  ;;  %vm466_vm2 = vcmp.gt.f32.partialorder %v2709_v0, 0.0  ;;  %v619_v3 = vld [vmem:[%s3069_s3 + $0xe8] sm:$0xff] }
 0x13a   : > { %v1427_v10 = vadd.f32 -1.0, %v1981_v38  ;;  %1913 = vmatprep.subr.bf16.mxu0 %v2804_v19  ;;  %v2888_v12 = vsel %vm675_vm5, %v694_v7, %v2860_v24  ;;  %1045 = vmatmul.mubr.f32.gmra.mrb[28].mxu0 %v2836_v18  ;;  %v1524_v7 = vld [vmem:[%s3069_s3 + $0x3f0] sm:$0xff]  ;;  %v2919_v49 = vpack.c.bf16 %v1507_v33, %v1506_v4  ;;  %vm467_vm3 = vcmp.gt.f32.partialorder %v2714_v20, 0.0  ;;  %v1509_v33 = vld [vmem:[%s3069_s3 + $0x378] sm:$0xff] }
 0x13b   : > { %v2893_v2 = vsel %vm464_vm0, %v2685_v1, %v1426_v41  ;;  %1843 = vmatpush3.bf16.msra.mxu1 %v1842_v36  ;;  %v2899_v5 = vsel %vm675_vm5, %v696_v53, %v2873_v17  ;;  %v600_v53 = vld [vmem:[%s3069_s3 + $0x50] sm:$0xff]  ;;  %v601_v36 = vld [vmem:[%s3069_s3 + $0x58] sm:$0xff]  ;;  %1915 = vmatpush3.bf16.msra.mxu0 %v2875_v42  ;;  %v1130_v62 = vrot.slane %v1063_v23, 1  ;;  %v2935_v41 = vpack.c.bf16 %v1525_v22, %v1524_v7 }
 0x13c   : > { %v1983_v1 = vpop.eup %1982  ;;  %572 = vst [vmem:[#allocation2 + $0x70] sm:$0xff] %v2893_v2  ;;  %v2909_v45 = vsel %vm465_vm1, %v2689_v26, %v1427_v10  ;;  %800 = vmatmul.mubr.f32.gmra.mrb[6].mxu1 %v2813_v9  ;;  %1845 = vmatprep.subr.bf16.mxu1 %v1844_v63  ;;  %v1149_v28 = vrot.slane %v2893_v2, 1  ;;  %v618_v63 = vld [vmem:[%s3069_s3 + $0xe0] sm:$0xff]  ;;  %v1508_v4 = vld [vmem:[%s3069_s3 + $0x370] sm:$0xff]  ;;  %v1850_v7 = vpack.c.bf16 %v601_v36, %v600_v53  ;;  %v621_v36 = vld [vmem:[%s3069_s3 + $0xf8] sm:$0xff] }
 0x13d   : > { %v1985_v35 = vpop.eup %1984  ;;  %573 = vst [vmem:[#allocation2 + $0x78] sm:$0xff] %v2909_v45  ;;  %v1428_v26 = vadd.f32 -1.0, %v1983_v1  ;;  %804 = vmatprep.mubr.f32.mxu1 %v2844_v43  ;;  %v1151_v58 = vrot.slane %v2909_v45, 1  ;;  %1049 = vmatprep.mubr.f32.mxu0 %v2909_v45  ;;  %v1852_v45 = vpack.c.bf16 %v619_v3, %v618_v63  ;;  %v2971_v53 = vpack.c.bf16 %v1509_v33, %v1508_v4  ;;  %v605_v4 = vld [vmem:[%s3069_s3 + $0x78] sm:$0xff] }
 0x13e   : > { %v1429_v38 = vadd.f32 -1.0, %v1985_v35  ;;  %1917 = vmatprep.subr.bf16.mxu0 %v2890_v55  ;;  %v2947_v10 = vsel %vm675_vm5, %v2860_v24, %v1149_v28  ;;  %1050 = vmatmul.mubr.f32.gmra.mrb[30].mxu0 %v2893_v2  ;;  %v1062_v35 = vld [vmem:[#allocation2 + $0x10] sm:$0xfe] }
 0x13f   : > { %v556_v23 = vsel %vm466_vm2, %v2709_v0, %v1428_v26  ;;  %1847 = vmatpush3.bf16.msra.mxu1 %v1846_v16  ;;  %v2955_v22 = vsel %vm675_vm5, %v2873_v17, %v1151_v58  ;;  %v602_v0 = vld [vmem:[%s3069_s3 + $0x60] sm:$0xff]  ;;  %v603_v16 = vld [vmem:[%s3069_s3 + $0x68] sm:$0xff]  ;;  %1919 = vmatpush3.bf16.msra.mxu0 %v2919_v49  ;;  %v1127_v33 = vrot.slane %v1062_v35, 1 }
 0x140   : > { %574 = vst [vmem:[#allocation2 + $0x80] sm:$0xff] %v556_v23  ;;  %v557_v1 = vsel %vm467_vm3, %v2714_v20, %v1429_v38  ;;  %805 = vmatmul.mubr.f32.gmra.mrb[8].mxu1 %v2818_v39  ;;  %1849 = vmatprep.subr.bf16.mxu1 %v1848_v21  ;;  %v1132_v20 = vsel %vm675_vm5, %v1130_v62, %v2738_v27  ;;  %v620_v21 = vld [vmem:[%s3069_s3 + $0xf0] sm:$0xff] }
 0x141   : > { %575 = vst [vmem:[#allocation2 + $0x88] sm:$0xff] %v557_v1  ;;  %809 = vmatprep.mubr.f32.mxu1 %v2899_v5  ;;  %1235 = vmatprep.mubr.f32.mxu0 %v1132_v20  ;;  %v1854_v63 = vpack.c.bf16 %v603_v16, %v602_v0  ;;  %v1856_v3 = vpack.c.bf16 %v621_v36, %v620_v21  ;;  %v604_v38 = vld [vmem:[%s3069_s3 + $0x70] sm:$0xff] }
 0x142   : > { %1921 = vmatprep.subr.bf16.mxu0 %v2935_v41  ;;  %v1858_v1 = vpack.c.bf16 %v605_v4, %v604_v38  ;;  %v1129_v16 = vsel %vm675_vm5, %v1127_v33, %v2741_v31 }
 0x143   : > { %1851 = vmatpush3.bf16.msra.mxu1 %v1850_v7  ;;  %v624_v26 = vld [vmem:[#allocation2 + $0x70] sm:$0x1]  ;;  %1923 = vmatpush3.bf16.msra.mxu0 %v2971_v53 }
 0x144   : > { %810 = vmatmul.mubr.f32.gmra.mrb[10].mxu1 %v2888_v12  ;;  %v625_v27 = vld [vmem:[#allocation2 + $0x78] sm:$0x1]  ;;  %1853 = vmatprep.subr.bf16.mxu1 %v1852_v45  ;;  %v702_v62 = vrot.slane %v624_v26, 1 }
 0x145   : > { %v704_v23 = vrot.slane %v625_v27, 1 }
 0x146   : > { %v703_v0 = vsel %vm675_vm5, %v2860_v24, %v702_v62  ;;  %1236 = vmatmul.mubr.f32.vlgmr.msra.gmra.mrb[32].mxu0 %v1129_v16 }
 0x147   : > { %v705_v7 = vsel %vm675_vm5, %v2873_v17, %v704_v23  ;;  %1855 = vmatpush3.bf16.msra.mxu1 %v1854_v63  ;;  %v1076_v45 = vld [vmem:[#allocation2 + $0x80] sm:$0x1] }
 0x148   : > { %814 = vmatprep.mubr.f32.mxu1 %v705_v7  ;;  %1857 = vmatprep.subr.bf16.mxu1 %v1856_v3  ;;  %v1077_v20 = vld [vmem:[#allocation2 + $0x88] sm:$0x1]  ;;  %v1153_v21 = vrot.slane %v1076_v45, 1  ;;  %v3041_v23 = vld [vmem:[%s3070_s4] ss:$0 sm:$0xff] }
 0x149   : > { %815 = vmatmul.mubr.f32.gmra.mrb[12].mxu1 %v703_v0  ;;  %v1155_v36 = vrot.slane %v1077_v20, 1 }
 0x14a   : > { %884 = vmatprep.mubr.f32.mxu1 %v2636_v50  ;;  %v1154_v17 = vsel %vm675_vm5, %v1149_v28, %v1153_v21 }
 0x14b   : > { %1859 = vmatpush3.bf16.msra.mxu1 %v1858_v1  ;;  %v1156_v35 = vsel %vm675_vm5, %v1151_v58, %v1155_v36 }
 0x14c   : > { %1924 = vmatprep.subr.bf16.mxu1 %v2417_v54 }
 0x14e   : > { %885 = vmatmul.mubr.f32.vlgmr.msra.gmra.mrb[14].mxu1 %v2630_v46 }
 0x14f   : > { %889 = vmatprep.mubr.f32.mxu1 %v2656_v25  ;;  %1932 = vmatpush3.bf16.msra.mxu1 %v2528_v44 }
 0x150   : > { %1925 = vmatprep.subr.bf16.mxu1 %v2542_v51 }
 0x152   : > { %890 = vmatmul.mubr.f32.gmra.mrb[16].mxu1 %v2650_v11 }
 0x153   : > { %894 = vmatprep.mubr.f32.mxu1 %v2682_v59  ;;  %1933 = vmatpush3.bf16.msra.mxu1 %v2544_v52 }
 0x154   : > { %1926 = vmatprep.subr.bf16.mxu1 %v2562_v60 }
 0x156   : > { %895 = vmatmul.mubr.f32.gmra.mrb[18].mxu1 %v2674_v47 }
 0x157   : > { %899 = vmatprep.mubr.f32.mxu1 %v2706_v56  ;;  %1934 = vmatpush3.bf16.msra.mxu1 %v2564_v61 }
 0x158   : > { %1927 = vmatprep.subr.bf16.mxu1 %v2596_v13 }
 0x15a   : > { %900 = vmatmul.mubr.f32.gmra.mrb[20].mxu1 %v2698_v34 }
 0x15b   : > { %904 = vmatprep.mubr.f32.mxu1 %v2735_v37  ;;  %1935 = vmatpush3.bf16.msra.mxu1 %v2598_v14 }
 0x15c   : > { %1928 = vmatprep.subr.bf16.mxu1 %v2618_v29 }
 0x15e   : > { %905 = vmatmul.mubr.f32.gmra.mrb[22].mxu1 %v2724_v15 }
 0x15f   : > { %909 = vmatprep.mubr.f32.mxu1 %v2780_v57  ;;  %1936 = vmatpush3.bf16.msra.mxu1 %v2620_v30 }
 0x160   : > { %1929 = vmatprep.subr.bf16.mxu1 %v2804_v19 }
 0x162   : > { %910 = vmatmul.mubr.f32.gmra.mrb[24].mxu1 %v2764_v8 }
 0x163   : > { %914 = vmatprep.mubr.f32.mxu1 %v2853_v40  ;;  %1937 = vmatpush3.bf16.msra.mxu1 %v2875_v42 }
 0x164   : > { %1930 = vmatprep.subr.bf16.mxu1 %v2890_v55 }
 0x166   : > { %915 = vmatmul.mubr.f32.gmra.mrb[26].mxu1 %v2836_v18 }
 0x167   : > { %1938 = vmatpush3.bf16.msra.mxu1 %v2919_v49  ;;  %1240 = vmatprep.mubr.f32.mxu1 %v2771_v32 }
 0x168   : > { %1931 = vmatprep.subr.bf16.mxu1 %v2935_v41 }
 0x16b   : > { %1939 = vmatpush3.bf16.msra.mxu1 %v2971_v53 }
 0x16e   : > { %1241 = vmatmul.mubr.f32.vlgmr.msra.gmra.mrb[28].mxu1 %v2775_v48 }
 0x16f   : > { %1245 = vmatprep.mubr.f32.mxu1 %v2810_v6 }
 0x172   : > { %1246 = vmatmul.mubr.f32.gmra.mrb[30].mxu1 %v2813_v9 }
 0x173   : > { %1250 = vmatprep.mubr.f32.mxu1 %v2844_v43 }
 0x176   : > { %1251 = vmatmul.mubr.f32.gmra.mrb[32].mxu1 %v2818_v39 }
 0x177   : > { %1255 = vmatprep.mubr.f32.mxu1 %v2899_v5 }
 0x17a   : > { %1256 = vmatmul.mubr.f32.gmra.mrb[34].mxu1 %v2888_v12 }
 0x17b   : > { %1260 = vmatprep.mubr.f32.mxu1 %v2955_v22 }
 0x17e   : > { %1261 = vmatmul.mubr.f32.gmra.mrb[36].mxu1 %v2947_v10 }
 0x17f   : > { %1265 = vmatprep.mubr.f32.mxu1 %v1156_v35 }
 0x182   : > { %1266 = vmatmul.mubr.f32.gmra.mrb[38].mxu1 %v1154_v17 }
 0x1f9   : > { %v1674_v54 = vpop.f32.mrb[18].mxu0 }
 0x1fa   : > { %v1675_v44 = vpop.f32.mrb[19].mxu0 }
 0x1fb   : > { %v1676_v51 = vadd.f32 %v1675_v44, %v1674_v54 }
 0x1fd   : > { %v1677_v52 = vpop.f32.mrb[20].mxu0 }
 0x1fe   : > { %v1678_v60 = vpop.f32.mrb[21].mxu0 }
 0x1ff   : > { %v1679_v61 = vadd.f32 %v1678_v60, %v1677_v52 }
 0x200   : > { %v1568_v13 = vpop.f32.mrb[0].mxu1 }
 0x201   : > { %v1680_v14 = vpop.f32.mrb[22].mxu0  ;;  %v1569_v29 = vpop.f32.mrb[1].mxu1 }
 0x202   : > { %v1681_v30 = vpop.f32.mrb[23].mxu0  ;;  %v1570_v46 = vadd.f32 %v1569_v29, %v1568_v13 }
 0x203   : > { %v1682_v50 = vadd.f32 %v1681_v30, %v1680_v14 }
 0x205   : > { %v1683_v11 = vpop.f32.mrb[24].mxu0 }
 0x206   : > { %v1684_v25 = vpop.f32.mrb[25].mxu0 }
 0x207   : > { %v1571_v47 = vpop.f32.mrb[2].mxu1  ;;  %v1685_v59 = vadd.f32 %v1684_v25, %v1683_v11 }
 0x208   : > { %v1572_v34 = vpop.f32.mrb[3].mxu1 }
 0x209   : > { %v1573_v56 = vadd.f32 %v1572_v34, %v1571_v47  ;;  %v1686_v15 = vpop.f32.mrb[26].mxu0 }
 0x20a   : > { %v1687_v31 = vpop.f32.mrb[27].mxu0 }
 0x20b   : > { %v1574_v37 = vpop.f32.mrb[4].mxu1  ;;  %v1688_v32 = vadd.f32 %v1687_v31, %v1686_v15 }
 0x20c   : > { %v1575_v8 = vpop.f32.mrb[5].mxu1 }
 0x20d   : > { %v1576_v48 = vadd.f32 %v1575_v8, %v1574_v37  ;;  %v1689_v57 = vpop.f32.mrb[28].mxu0 }
 0x20e   : > { %v1690_v6 = vpop.f32.mrb[29].mxu0 }
 0x20f   : > { %v1577_v19 = vpop.f32.mrb[6].mxu1  ;;  %v1691_v39 = vadd.f32 %v1690_v6, %v1689_v57 }
 0x210   : > { %v1578_v9 = vpop.f32.mrb[7].mxu1 }
 0x211   : > { %v1579_v18 = vadd.f32 %v1578_v9, %v1577_v19  ;;  %v1692_v43 = vpop.f32.mrb[30].mxu0 }
 0x212   : > { %v1693_v24 = vpop.f32.mrb[31].mxu0 }
 0x213   : > { %v1580_v40 = vpop.f32.mrb[8].mxu1  ;;  %v1694_v12 = vadd.f32 %v1693_v24, %v1692_v43 }
 0x214   : > { %v1581_v42 = vpop.f32.mrb[9].mxu1 }
 0x215   : > { %v1582_v55 = vadd.f32 %v1581_v42, %v1580_v40 }
 0x217   : > { %v1583_v2 = vpop.f32.mrb[10].mxu1 }
 0x218   : > { %v1584_v5 = vpop.f32.mrb[11].mxu1 }
 0x219   : > { %v1585_v49 = vadd.f32 %v1584_v5, %v1583_v2  ;;  %v1727_v58 = vpop.f32.mrb[32].mxu0 }
 0x21a   : > { %v1728_v10 = vpop.f32.mrb[33].mxu0 }
 0x21b   : > { %v1729_v53 = vadd.f32 %v1728_v10, %v1727_v58 }
 0x21c   : > { %v1586_v28 = vpop.f32.mrb[12].mxu1 }
 0x21d   : > { %v1587_v41 = vpop.f32.mrb[13].mxu1 }
 0x21e   : > { %v1588_v22 = vadd.f32 %v1587_v41, %v1586_v28 }
 0x221   : > { %v1621_v26 = vpop.f32.mrb[14].mxu1 }
 0x222   : > { %v1622_v63 = vpop.f32.mrb[15].mxu1 }
 0x223   : > { %v1623_v27 = vadd.f32 %v1622_v63, %v1621_v26 }
 0x225   : > { %v887_v62 = vadd.f32 %v1623_v27, %v1570_v46  ;;  %v1624_v3 = vpop.f32.mrb[16].mxu1 }
 0x226   : > { %v1625_v38 = vpop.f32.mrb[17].mxu1 }
 0x227   : > { %v1055_v4 = vadd.f32 %v1676_v51, %v887_v62  ;;  %v1626_v33 = vadd.f32 %v1625_v38, %v1624_v3 }
 0x229   : > { %v1271_v7 = vadd.f32 %v1729_v53, %v1055_v4  ;;  %v892_v1 = vadd.f32 %v1626_v33, %v1573_v56  ;;  %v1627_v45 = vpop.f32.mrb[18].mxu1 }
 0x22a   : > { %v1628_v0 = vpop.f32.mrb[19].mxu1 }
 0x22b   : > { %v1285_v16 = vadd.f32 %v3041_v23, %v1271_v7  ;;  %v1629_v20 = vadd.f32 %v1628_v0, %v1627_v45  ;;  %v1056_v21 = vadd.f32 %v1679_v61, %v892_v1 }
 0x22d   : > { %v1299_v36 = vmin.f32 %v1285_v16, 0.0  ;;  %v897_v17 = vadd.f32 %v1629_v20, %v1576_v48  ;;  %v1630_v35 = vpop.f32.mrb[20].mxu1  ;;  %vm1292_vm4 = vcmp.gt.f32.partialorder %v1285_v16, 0.0 }
 0x22e   : > { %v1631_v54 = vpop.f32.mrb[21].mxu1 }
 0x22f   : > { %v1306_v44 = vmul.f32 1.442695, %v1299_v36  ;;  %v1632_v51 = vadd.f32 %v1631_v54, %v1630_v35  ;;  %v1057_v52 = vadd.f32 %v1682_v50, %v897_v17 }
 0x231   : > { %1986 = vpow2.f32 %v1306_v44  ;;  %v902_v60 = vadd.f32 %v1632_v51, %v1579_v18  ;;  %v1633_v13 = vpop.f32.mrb[22].mxu1 }
 0x232   : > { %v1634_v14 = vpop.f32.mrb[23].mxu1 }
 0x233   : > { %v1635_v29 = vadd.f32 %v1634_v14, %v1633_v13  ;;  %v1058_v30 = vadd.f32 %v1685_v59, %v902_v60 }
 0x235   : > { %v907_v46 = vadd.f32 %v1635_v29, %v1582_v55  ;;  %v1636_v11 = vpop.f32.mrb[24].mxu1 }
 0x236   : > { %v1637_v25 = vpop.f32.mrb[25].mxu1 }
 0x237   : > { %v1638_v47 = vadd.f32 %v1637_v25, %v1636_v11  ;;  %v1059_v34 = vadd.f32 %v1688_v32, %v907_v46 }
 0x239   : > { %v912_v61 = vadd.f32 %v1638_v47, %v1585_v49  ;;  %v1639_v56 = vpop.f32.mrb[26].mxu1 }
 0x23a   : > { %v1640_v15 = vpop.f32.mrb[27].mxu1 }
 0x23b   : > { %v1987_v37 = vpop.eup %1986  ;;  %v1641_v31 = vadd.f32 %v1640_v15, %v1639_v56  ;;  %v1060_v8 = vadd.f32 %v1691_v39, %v912_v61 }
 0x23c   : > { %v1527_v50 = vadd.f32 -1.0, %v1987_v37 }
 0x23d   : > { %v917_v59 = vadd.f32 %v1641_v31, %v1588_v22 }
 0x23e   : > { %v1327_v48 = vsel %vm1292_vm4, %v1285_v16, %v1527_v50 }
 0x23f   : > { %1334 = vst [vmem:[%s3048_s15] sm:$0xff] %v1327_v48  ;;  %v1061_v57 = vadd.f32 %v1694_v12, %v917_v59 }
 0x241   : > { %v1730_v32 = vpop.f32.mrb[28].mxu1 }
 0x242   : > { %v1731_v19 = vpop.f32.mrb[29].mxu1 }
 0x243   : > { %v1732_v6 = vadd.f32 %v1731_v19, %v1730_v32 }
 0x245   : > { %v1272_v9 = vadd.f32 %v1732_v6, %v1056_v21  ;;  %v1733_v18 = vpop.f32.mrb[30].mxu1 }
 0x246   : > { %v1734_v43 = vpop.f32.mrb[31].mxu1 }
 0x247   : > { %v1286_v39 = vadd.f32 %v3041_v23, %v1272_v9  ;;  %v1735_v40 = vadd.f32 %v1734_v43, %v1733_v18 }
 0x249   : > { %v1300_v24 = vmin.f32 %v1286_v39, 0.0  ;;  %v1273_v42 = vadd.f32 %v1735_v40, %v1057_v52  ;;  %v1736_v55 = vpop.f32.mrb[32].mxu1  ;;  %vm1293_vm5 = vcmp.gt.f32.partialorder %v1286_v39, 0.0 }
 0x24a   : > { %v1737_v2 = vpop.f32.mrb[33].mxu1 }
 0x24b   : > { %v1308_v5 = vmul.f32 1.442695, %v1300_v24  ;;  %v1287_v49 = vadd.f32 %v3041_v23, %v1273_v42  ;;  %v1738_v28 = vadd.f32 %v1737_v2, %v1736_v55 }
 0x24d   : > { %1988 = vpow2.f32 %v1308_v5  ;;  %v1301_v58 = vmin.f32 %v1287_v49, 0.0  ;;  %v1274_v12 = vadd.f32 %v1738_v28, %v1058_v30  ;;  %v1739_v41 = vpop.f32.mrb[34].mxu1  ;;  %vm1294_vm6 = vcmp.gt.f32.partialorder %v1287_v49, 0.0 }
 0x24e   : > { %v1740_v10 = vpop.f32.mrb[35].mxu1 }
 0x24f   : > { %v1310_v22 = vmul.f32 1.442695, %v1301_v58  ;;  %v1288_v53 = vadd.f32 %v3041_v23, %v1274_v12  ;;  %v1741_v26 = vadd.f32 %v1740_v10, %v1739_v41 }
 0x251   : > { %1990 = vpow2.f32 %v1310_v22  ;;  %v1302_v63 = vmin.f32 %v1288_v53, 0.0  ;;  %v1275_v27 = vadd.f32 %v1741_v26, %v1059_v34  ;;  %v1742_v62 = vpop.f32.mrb[36].mxu1  ;;  %vm1295_vm7 = vcmp.gt.f32.partialorder %v1288_v53, 0.0 }
 0x252   : > { %v1743_v3 = vpop.f32.mrb[37].mxu1 }
 0x253   : > { %v1312_v38 = vmul.f32 1.442695, %v1302_v63  ;;  %v1289_v4 = vadd.f32 %v3041_v23, %v1275_v27  ;;  %v1744_v33 = vadd.f32 %v1743_v3, %v1742_v62 }
 0x255   : > { %1992 = vpow2.f32 %v1312_v38  ;;  %v1303_v7 = vmin.f32 %v1289_v4, 0.0  ;;  %v1276_v1 = vadd.f32 %v1744_v33, %v1060_v8  ;;  %v1745_v45 = vpop.f32.mrb[38].mxu1  ;;  %vm1296_vm8 = vcmp.gt.f32.partialorder %v1289_v4, 0.0 }
 0x256   : > { %v1746_v0 = vpop.f32.mrb[39].mxu1 }
 0x257   : > { %v1989_v16 = vpop.eup %1988  ;;  %v1314_v20 = vmul.f32 1.442695, %v1303_v7  ;;  %v1290_v21 = vadd.f32 %v3041_v23, %v1276_v1  ;;  %v1747_v36 = vadd.f32 %v1746_v0, %v1745_v45 }
 0x258   : > { %v1528_v17 = vadd.f32 -1.0, %v1989_v16 }
 0x259   : > { %1994 = vpow2.f32 %v1314_v20  ;;  %v1304_v35 = vmin.f32 %v1290_v21, 0.0  ;;  %v1277_v54 = vadd.f32 %v1747_v36, %v1061_v57  ;;  %vm1297_vm9 = vcmp.gt.f32.partialorder %v1290_v21, 0.0 }
 0x25a   : > { %v1328_v44 = vsel %vm1293_vm5, %v1286_v39, %v1528_v17 }
 0x25b   : > { %v1991_v51 = vpop.eup %1990  ;;  %1335 = vst [vmem:[%s3048_s15 + $0x8] sm:$0xff] %v1328_v44  ;;  %v1316_v52 = vmul.f32 1.442695, %v1304_v35  ;;  %v1291_v60 = vadd.f32 %v3041_v23, %v1277_v54 }
 0x25c   : > { %v1529_v13 = vadd.f32 -1.0, %v1991_v51 }
 0x25d   : > { %1996 = vpow2.f32 %v1316_v52  ;;  %v1305_v14 = vmin.f32 %v1291_v60, 0.0  ;;  %vm1298_vm10 = vcmp.gt.f32.partialorder %v1291_v60, 0.0 }
 0x25e   : > { %v1329_v29 = vsel %vm1294_vm6, %v1287_v49, %v1529_v13 }
 0x25f   : > { %v1993_v30 = vpop.eup %1992  ;;  %1336 = vst [vmem:[%s3048_s15 + $0x10] sm:$0xff] %v1329_v29  ;;  %v1318_v46 = vmul.f32 1.442695, %v1305_v14 }
 0x260   : > { %v1530_v11 = vadd.f32 -1.0, %v1993_v30 }
 0x261   : > { %1998 = vpow2.f32 %v1318_v46 }
 0x262   : > { %v1330_v25 = vsel %vm1295_vm7, %v1288_v53, %v1530_v11 }
 0x263   : > { %v1995_v47 = vpop.eup %1994  ;;  %1337 = vst [vmem:[%s3048_s15 + $0x18] sm:$0xff] %v1330_v25 }
 0x264   : > { %v1531_v34 = vadd.f32 -1.0, %v1995_v47 }
 0x266   : > { %v1331_v23 = vsel %vm1296_vm8, %v1289_v4, %v1531_v34 }
 0x267   : > { %v1997_v61 = vpop.eup %1996  ;;  %1338 = vst [vmem:[%s3048_s15 + $0x20] sm:$0xff] %v1331_v23 }
 0x268   : > { %v1532_v56 = vadd.f32 -1.0, %v1997_v61 }
 0x26a   : > { %v1332_v15 = vsel %vm1297_vm9, %v1290_v21, %v1532_v56 }
 0x26b   : > { %v1999_v37 = vpop.eup %1998  ;;  %1339 = vst [vmem:[%s3048_s15 + $0x28] sm:$0xff] %v1332_v15 }
 0x26c   : > { %v1533_v31 = vadd.f32 -1.0, %v1999_v37 }
 0x26e   : > { %v1333_v8 = vsel %vm1298_vm10, %v1291_v60, %v1533_v31 }
 0x26f   : > { %1340 = vst [vmem:[%s3048_s15 + $0x30] sm:$0xff] %v1333_v8 }
 0x270 PF: > { %s15_s18 = sadd.s32 1, %s2006_s18  }
 0x271   : > { %p12_p4 = scmp.ge.s32.totalorder %s15_s18, 4  }
 0x273   :  { %14 = sbr.rel (!%p12_p4) target bundleno = 1 (0x1), region = 73 }

</bundles_post_ra>
